<compile_context>
chip_gen: v7x
topology: tpu7x:2x2x1
jax: 0.10.0
libtpu: 0.0.40
codegen_flags: <defaults>
</compile_context>

<pallas_src>
import functools
import math

import jax
import jax.numpy as jnp
from jax import lax
from jax.experimental import pallas as pl
from jax.experimental.pallas import tpu as pltpu


_VMEM_LIMIT = 32 * 1024 * 1024
_DN_LAST = (((2,), (0,)), ((), ()))   # contract last axis of lhs with first of rhs

# Set by the runtime probe in __main__ (False = safe 2-D matmul fallback).
_USE_3D_DOT = False


# ----------------------------------------------------------------------------
# Core contraction helper: (H, W, Cin) @ (Cin, Cout) -> (H, W, Cout), f32 acc.
# ----------------------------------------------------------------------------
def _contract(patch, w):
    if _USE_3D_DOT:
        return lax.dot_general(patch, w, _DN_LAST,
                               preferred_element_type=jnp.float32)
    h, wd, cin = patch.shape
    out = jnp.dot(patch.reshape(h * wd, cin), w,
                  preferred_element_type=jnp.float32)
    return out.reshape(h, wd, w.shape[-1])


def _probe_kernel(x_ref, w_ref, o_ref):
    o_ref[...] = lax.dot_general(x_ref[...], w_ref[...], _DN_LAST,
                                 preferred_element_type=jnp.float32)


def _check_3d_dot_support():
    """True iff Mosaic lowers a rank-3 x rank-2 dot_general correctly on this backend."""
    shapes = [((16, 16, 3), (3, 16)), ((16, 16, 32), (32, 16))]
    try:
        for xs, ws in shapes:
            x = jax.random.normal(jax.random.PRNGKey(1), xs, jnp.float32)
            w = jax.random.normal(jax.random.PRNGKey(2), ws, jnp.float32)
            out = pl.pallas_call(
                _probe_kernel,
                out_shape=jax.ShapeDtypeStruct(xs[:2] + (ws[1],), jnp.float32),
            )(x, w)
            out = jax.block_until_ready(out)
            ref = jnp.einsum("hwc,co->hwo", x, w,
                             precision=lax.Precision.HIGHEST)
            if not bool(jnp.allclose(out, ref, rtol=1e-4, atol=1e-4)):
                return False
        return True
    except Exception:
        return False


# ----------------------------------------------------------------------------
# Generic same-padding KxK conv kernel (head, tail 3x3 convs, upsampler convs).
# ----------------------------------------------------------------------------
def _conv_kernel(x_ref, w_ref, b_ref, o_ref, xp_ref, *, KH, KW, H, W, relu):
    ph, pw = KH // 2, KW // 2
    Cout = w_ref.shape[-1]

    # Stage the zero-padded input once in VMEM (no host-side jnp.pad).
    xp_ref[...] = jnp.zeros_like(xp_ref)
    xp_ref[ph:ph + H, pw:pw + W, :] = x_ref[0]

    acc = jnp.zeros((H, W, Cout), jnp.float32)
    for kh in range(KH):
        for kw in range(KW):
            acc = acc + _contract(xp_ref[kh:kh + H, kw:kw + W, :], w_ref[kh, kw])
    acc = acc + b_ref[...]
    if relu:
        acc = jnp.maximum(acc, 0.0)
    o_ref[0] = acc.astype(o_ref.dtype)


def conv2d_nhwc(x, w, b, *, relu=False):
    """Stride-1, same-padding conv in NHWC; grid over batch, whole image per block."""
    N, H, W, Cin = x.shape
    KH, KW, _, Cout = w.shape
    ph, pw = KH // 2, KW // 2
    kernel = functools.partial(_conv_kernel, KH=KH, KW=KW, H=H, W=W, relu=relu)

    flops = 2 * N * H * W * Cin * Cout * KH * KW
    bytes_accessed = 4 * (x.size + w.size + Cout + N * H * W * Cout)

    return pl.pallas_call(
        kernel,
        out_shape=jax.ShapeDtypeStruct((N, H, W, Cout), x.dtype),
        grid=(N,),
        in_specs=[
            pl.BlockSpec((1, H, W, Cin), lambda n: (n, 0, 0, 0)),
            pl.BlockSpec((KH, KW, Cin, Cout), lambda n: (0, 0, 0, 0)),
            pl.BlockSpec((1, 1, Cout), lambda n: (0, 0, 0)),
        ],
        out_specs=pl.BlockSpec((1, H, W, Cout), lambda n: (n, 0, 0, 0)),
        scratch_shapes=[pltpu.VMEM((H + 2 * ph, W + 2 * pw, Cin), x.dtype)],
        compiler_params=pltpu.CompilerParams(
            dimension_semantics=("parallel",),
            vmem_limit_bytes=_VMEM_LIMIT),
        cost_estimate=pl.CostEstimate(flops=flops, transcendentals=0,
                                      bytes_accessed=bytes_accessed),
    )(x, w, b.reshape(1, 1, Cout))


# ----------------------------------------------------------------------------
# Fused MSRB stage kernel: {3x3, 5x5} branches (+ReLU), optionally followed by
# the 1x1 "confusion" projection and the residual add.
# ----------------------------------------------------------------------------
def _msrb_stage_kernel(*args, H, W, project):
    if project:
        (x_ref, w3_ref, b3_ref, w5_ref, b5_ref,
         wc_ref, bc_ref, res_ref, o_ref, xp_ref) = args
    else:
        (x_ref, w3_ref, b3_ref, w5_ref, b5_ref, o_ref, xp_ref) = args

    Fb = w3_ref.shape[-1]

    # One padded staging buffer (pad=2 for the 5x5); the 3x3 reads its inner window.
    xp_ref[...] = jnp.zeros_like(xp_ref)
    xp_ref[2:2 + H, 2:2 + W, :] = x_ref[0]

    acc3 = jnp.zeros((H, W, Fb), jnp.float32)
    acc5 = jnp.zeros((H, W, Fb), jnp.float32)
    for kh in range(5):
        for kw in range(5):
            patch = xp_ref[kh:kh + H, kw:kw + W, :]        # shared by both branches
            acc5 = acc5 + _contract(patch, w5_ref[kh, kw])
            if 1 <= kh <= 3 and 1 <= kw <= 3:
                acc3 = acc3 + _contract(patch, w3_ref[kh - 1, kw - 1])

    o3 = jnp.maximum(acc3 + b3_ref[...], 0.0)
    o5 = jnp.maximum(acc5 + b5_ref[...], 0.0)

    if project:
        # Fused 1x1 confusion + residual: the 4F concat never leaves VMEM/registers.
        out = (_contract(o3, wc_ref[0]) + _contract(o5, wc_ref[1])
               + bc_ref[...] + res_ref[0].astype(jnp.float32))
        o_ref[0] = out.astype(o_ref.dtype)
    else:
        # Single lane-dense store of the already-concatenated branch outputs.
        o_ref[0] = jnp.concatenate([o3, o5], axis=-1).astype(o_ref.dtype)


def msrb_dual_conv(x, w3, b3, w5, b5, *, wc=None, bc=None, res=None):
    N, H, W, Cin = x.shape
    Fb = w3.shape[-1]
    project = wc is not None
    Cout = wc.shape[-1] if project else 2 * Fb

    kernel = functools.partial(_msrb_stage_kernel, H=H, W=W, project=project)

    in_specs = [
        pl.BlockSpec((1, H, W, Cin), lambda n: (n, 0, 0, 0)),
        pl.BlockSpec(w3.shape, lambda n: (0, 0, 0, 0)),
        pl.BlockSpec((1, 1, Fb), lambda n: (0, 0, 0)),
        pl.BlockSpec(w5.shape, lambda n: (0, 0, 0, 0)),
        pl.BlockSpec((1, 1, Fb), lambda n: (0, 0, 0)),
    ]
    args = [x, w3, b3.reshape(1, 1, Fb), w5, b5.reshape(1, 1, Fb)]

    flops = 2 * N * H * W * Cin * Fb * (9 + 25)
    bytes_accessed = 4 * (x.size + w3.size + w5.size + N * H * W * Cout)
    if project:
        in_specs += [
            pl.BlockSpec(wc.shape, lambda n: (0, 0, 0)),
            pl.BlockSpec((1, 1, Cout), lambda n: (0, 0, 0)),
            pl.BlockSpec((1, H, W, Cout), lambda n: (n, 0, 0, 0)),
        ]
        args += [wc, bc.reshape(1, 1, Cout), res]
        flops += 2 * N * H * W * (2 * Fb) * Cout
        bytes_accessed += 4 * (wc.size + res.size)

    return pl.pallas_call(
        kernel,
        out_shape=jax.ShapeDtypeStruct((N, H, W, Cout), x.dtype),
        grid=(N,),
        in_specs=in_specs,
        out_specs=pl.BlockSpec((1, H, W, Cout), lambda n: (n, 0, 0, 0)),
        scratch_shapes=[pltpu.VMEM((H + 4, W + 4, Cin), x.dtype)],
        compiler_params=pltpu.CompilerParams(
            dimension_semantics=("parallel",),
            vmem_limit_bytes=_VMEM_LIMIT),
        cost_estimate=pl.CostEstimate(flops=flops, transcendentals=0,
                                      bytes_accessed=bytes_accessed),
    )(*args)


# ----------------------------------------------------------------------------
# Tail 1x1 over the skip "concat": sum of per-block 1x1 matmuls, no concat in HBM.
# ----------------------------------------------------------------------------
def _skip_fuse_kernel(*args, n_in):
    xs = args[:n_in]
    w_ref, b_ref, o_ref = args[n_in], args[n_in + 1], args[n_in + 2]
    acc = jnp.zeros(o_ref.shape[1:], jnp.float32)
    for i in range(n_in):
        acc = acc + _contract(xs[i][0], w_ref[i])
    o_ref[0] = (acc + b_ref[...]).astype(o_ref.dtype)


def skip_fuse_1x1(xs, w, b):
    """1x1 conv over channel-concat(xs) without materializing the concatenation."""
    n_in = len(xs)
    N, H, W, F = xs[0].shape
    Cout = w.shape[-1]
    w_split = w[0, 0].reshape(n_in, F, Cout)   # HWIO (1,1,n_in*F,Cout) -> (n_in, F, Cout)
    kernel = functools.partial(_skip_fuse_kernel, n_in=n_in)

    in_specs = [pl.BlockSpec((1, H, W, F), lambda n: (n, 0, 0, 0)) for _ in range(n_in)]
    in_specs += [
        pl.BlockSpec((n_in, F, Cout), lambda n: (0, 0, 0)),
        pl.BlockSpec((1, 1, Cout), lambda n: (0, 0, 0)),
    ]
    flops = 2 * N * H * W * n_in * F * Cout
    bytes_accessed = 4 * (n_in * N * H * W * F + n_in * F * Cout + N * H * W * Cout)

    return pl.pallas_call(
        kernel,
        out_shape=jax.ShapeDtypeStruct((N, H, W, Cout), xs[0].dtype),
        grid=(N,),
        in_specs=in_specs,
        out_specs=pl.BlockSpec((1, H, W, Cout), lambda n: (n, 0, 0, 0)),
        compiler_params=pltpu.CompilerParams(
            dimension_semantics=("parallel",),
            vmem_limit_bytes=_VMEM_LIMIT),
        cost_estimate=pl.CostEstimate(flops=flops, transcendentals=0,
                                      bytes_accessed=bytes_accessed),
    )(*xs, w_split, b.reshape(1, 1, Cout))


# ----------------------------------------------------------------------------
# Glue (pure layout plumbing, no heavy compute)
# ----------------------------------------------------------------------------
def pixel_shuffle_nhwc(x, r):
    # PyTorch PixelShuffle: out[n, c, h*r+i, w*r+j] = in[n, c*r*r + i*r + j, h, w]
    N, H, W, C = x.shape
    Co = C // (r * r)
    x = x.reshape(N, H, W, Co, r, r)
    x = jnp.transpose(x, (0, 1, 4, 2, 5, 3))
    return x.reshape(N, H * r, W * r, Co)


# ----------------------------------------------------------------------------
# Deterministic synthetic parameters (HWIO layout)
# ----------------------------------------------------------------------------
def _init_conv(key, kh, kw, cin, cout):
    kw_key, kb_key = jax.random.split(key)
    fan_in = kh * kw * cin
    w = jax.random.normal(kw_key, (kh, kw, cin, cout), jnp.float32) / jnp.sqrt(fan_in)
    b = 0.01 * jax.random.normal(kb_key, (cout,), jnp.float32)
    return w, b


def init_msrn_params(key, scale, rgb_range, n_colors, n_feats, n_blocks, kernel_size):
    assert n_colors == 3, "MeanShift is defined for RGB (3 channels)"
    rgb_mean = jnp.array([0.4488, 0.4371, 0.4040], jnp.float32)
    rgb_std = jnp.array([1.0, 1.0, 1.0], jnp.float32)
    inv_std = 1.0 / rgb_std

    keys = iter(jax.random.split(key, 128))

    def conv_p(ks, cin, cout):
        return _init_conv(next(keys), ks, ks, cin, cout)

    # MeanShift (1x1 conv with diag weight eye/std) == per-channel affine.
    params = {
        "sub_mean": {"scale": inv_std, "bias": (-1.0) * rgb_range * rgb_mean * inv_std},
        "add_mean": {"scale": inv_std, "bias": (+1.0) * rgb_range * rgb_mean * inv_std},
        "head": conv_p(kernel_size, n_colors, n_feats),
    }

    body = []
    for _ in range(n_blocks):
        body.append({
            "conv_3_1": conv_p(3, n_feats, n_feats),
            "conv_5_1": conv_p(5, n_feats, n_feats),
            "conv_3_2": conv_p(3, 2 * n_feats, 2 * n_feats),
            "conv_5_2": conv_p(5, 2 * n_feats, 2 * n_feats),
            "confusion": conv_p(1, 4 * n_feats, n_feats),
        })
    params["body"] = body

    up_convs = []
    if (scale & (scale - 1)) == 0:
        for _ in range(int(math.log(scale, 2))):
            w, b = conv_p(3, n_feats, 4 * n_feats)
            up_convs.append((w, b, 2))
    elif scale == 3:
        w, b = conv_p(3, n_feats, 9 * n_feats)
        up_convs.append((w, b, 3))
    else:
        raise NotImplementedError

    params["tail"] = {
        "conv1": conv_p(1, n_feats * (n_blocks + 1), n_feats),
        "conv2": conv_p(kernel_size, n_feats, n_feats),
        "up_convs": up_convs,
        "conv3": conv_p(kernel_size, n_feats, n_colors),
    }
    return params


# ----------------------------------------------------------------------------
# Forward pass (mirrors MSRN.forward / MSRB.forward exactly)
# ----------------------------------------------------------------------------
def msrb_forward(p, x):
    n_feats = x.shape[-1]
    w3_1, b3_1 = p["conv_3_1"]
    w5_1, b5_1 = p["conv_5_1"]
    # stage 1: relu(conv3) || relu(conv5)  (concat produced directly, input read once)
    in2 = msrb_dual_conv(x, w3_1, b3_1, w5_1, b5_1)

    w3_2, b3_2 = p["conv_3_2"]
    w5_2, b5_2 = p["conv_5_2"]
    wc, bc = p["confusion"]
    wc_split = wc[0, 0].reshape(2, 2 * n_feats, n_feats)
    # stage 2: branches + relu + fused 1x1 confusion + residual add
    return msrb_dual_conv(in2, w3_2, b3_2, w5_2, b5_2, wc=wc_split, bc=bc, res=x)


def msrn_forward(params, x_nchw):
    x = jnp.transpose(x_nchw, (0, 2, 3, 1))                # NCHW -> NHWC

    # sub_mean (diagonal 1x1 conv) as an exact per-channel affine (VPU, no kernel launch)
    x = x * params["sub_mean"]["scale"] + params["sub_mean"]["bias"]
    x = conv2d_nhwc(x, *params["head"])
    res = x

    skip = []
    for blk in params["body"]:
        x = msrb_forward(blk, x)
        skip.append(x)
    skip.append(res)

    t = params["tail"]
    x = skip_fuse_1x1(skip, *t["conv1"])                   # 1x1 over implicit skip concat
    x = conv2d_nhwc(x, *t["conv2"])
    for (w, b, r) in t["up_convs"]:                        # Upsampler
        x = conv2d_nhwc(x, w, b)
        x = pixel_shuffle_nhwc(x, r)

    # add_mean (diagonal 1x1 conv) folded exactly into the last conv's weights/bias
    w3, b3 = t["conv3"]
    a_scale = params["add_mean"]["scale"]
    a_bias = params["add_mean"]["bias"]
    x = conv2d_nhwc(x, w3 * a_scale[None, None, None, :], b3 * a_scale + a_bias)

    return jnp.transpose(x, (0, 3, 1, 2))                  # back to NCHW


# ----------------------------------------------------------------------------
# Pure-JAX reference (lax.conv) for correctness validation of the fusions
# ----------------------------------------------------------------------------
def _conv_ref(x, w, b):
    y = lax.conv_general_dilated(x, w, window_strides=(1, 1), padding="SAME",
                                 dimension_numbers=("NHWC", "HWIO", "NHWC"),
                                 precision=lax.Precision.HIGHEST)
    return y + b.reshape(1, 1, 1, -1)


def msrn_reference(params, x_nchw):
    x = jnp.transpose(x_nchw, (0, 2, 3, 1))
    x = x * params["sub_mean"]["scale"] + params["sub_mean"]["bias"]
    x = _conv_ref(x, *params["head"])
    res = x
    outs = []
    for blk in params["body"]:
        o31 = jax.nn.relu(_conv_ref(x, *blk["conv_3_1"]))
        o51 = jax.nn.relu(_conv_ref(x, *blk["conv_5_1"]))
        in2 = jnp.concatenate([o31, o51], axis=-1)
        o32 = jax.nn.relu(_conv_ref(in2, *blk["conv_3_2"]))
        o52 = jax.nn.relu(_conv_ref(in2, *blk["conv_5_2"]))
        in3 = jnp.concatenate([o32, o52], axis=-1)
        x = _conv_ref(in3, *blk["confusion"]) + x
        outs.append(x)
    outs.append(res)
    cat = jnp.concatenate(outs, axis=-1)
    t = params["tail"]
    x = _conv_ref(cat, *t["conv1"])
    x = _conv_ref(x, *t["conv2"])
    for (w, b, r) in t["up_convs"]:
        x = _conv_ref(x, w, b)
        x = pixel_shuffle_nhwc(x, r)
    x = _conv_ref(x, *t["conv3"])
    x = x * params["add_mean"]["scale"] + params["add_mean"]["bias"]
    return jnp.transpose(x, (0, 3, 1, 2))


# ----------------------------------------------------------------------------
if __name__ == "__main__":
    # Small, deterministic configuration (mirrors the PyTorch module structure).
    scale = 2
    rgb_range = 1.0
    n_colors = 3
    n_feats = 16
    n_blocks = 2
    kernel_size = 3

    # Resolve whether the rank-3 dot_general path lowers on this backend
    # (must happen before any real kernel is traced).
    _USE_3D_DOT = _check_3d_dot_support()

    root_key = jax.random.PRNGKey(0)
    pkey, xkey = jax.random.split(root_key)

    params = init_msrn_params(pkey, scale, rgb_range, n_colors, n_feats,
                              n_blocks, kernel_size)

    x = jax.random.uniform(xkey, (2, n_colors, 16, 16), jnp.float32)  # NCHW like PyTorch

    y = msrn_forward(params, x)
    y = jax.block_until_ready(y)

    assert y.shape == (2, n_colors, 16 * scale, 16 * scale), y.shape
    assert y.dtype == jnp.float32
    assert bool(jnp.all(jnp.isfinite(y)))

    # Validate the fused Pallas path against a pure-JAX convolution reference.
    y_ref = jax.block_until_ready(msrn_reference(params, x))
    assert bool(jnp.allclose(y, y_ref, rtol=1e-3, atol=1e-3)), \
        float(jnp.max(jnp.abs(y - y_ref)))

    print("KERNEL_OK")
</pallas_src>

<mosaic_0001>
module attributes {stable_mosaic.version = 11 : i64} {
  func.func @_probe_kernel(%arg0: memref<16x16x3xf32, #tpu.memory_space<vmem>>, %arg1: memref<3x16xf32, #tpu.memory_space<vmem>>, %arg2: memref<16x16x16xf32, #tpu.memory_space<vmem>>) attributes {dimension_semantics = [], scalar_prefetch = 0 : i64, scratch_operands = 0 : i64, tpu.core_type = #tpu.core_type<tc>} {
    %c0 = arith.constant 0 : index
    %c0_0 = arith.constant 0 : index
    %c0_1 = arith.constant 0 : index
    %0 = vector.load %arg0[%c0, %c0_0, %c0_1] : memref<16x16x3xf32, #tpu.memory_space<vmem>>, vector<16x16x3xf32>
    %c0_2 = arith.constant 0 : index
    %c0_3 = arith.constant 0 : index
    %1 = vector.load %arg1[%c0_2, %c0_3] : memref<3x16xf32, #tpu.memory_space<vmem>>, vector<3x16xf32>
    %cst = arith.constant dense<0.000000e+00> : vector<16x16x16xf32>
    %2 = tpu.matmul %0, %1, %cst {dimension_numbers = #tpu.dot_dimension_numbers<[2], [0], [0, 1], [1], [0, 0, 0, 1, 1, 1], [], []>} : vector<16x16x3xf32>, vector<3x16xf32>, vector<16x16x16xf32> -> vector<16x16x16xf32>
    %c0_4 = arith.constant 0 : index
    %c0_5 = arith.constant 0 : index
    %c0_6 = arith.constant 0 : index
    %3 = vector.load %arg2[%c0_4, %c0_5, %c0_6] : memref<16x16x16xf32, #tpu.memory_space<vmem>>, vector<16x16x16xf32>
    tpu.vector_store %arg2[%c0_4, %c0_5, %c0_6], %2 {strides = array<i32>} : memref<16x16x16xf32, #tpu.memory_space<vmem>>, vector<16x16x16xf32>,
    return
  }
}

module attributes {stable_mosaic.version = 11 : i64} {
  func.func @_conv_kernel(%arg0: i32, %arg1: memref<1x16x16x3xf32, #tpu.memory_space<vmem>>, %arg2: memref<3x3x3x16xf32, #tpu.memory_space<vmem>>, %arg3: memref<1x1x16xf32, #tpu.memory_space<vmem>>, %arg4: memref<1x16x16x16xf32, #tpu.memory_space<vmem>>, %arg5: memref<18x18x3xf32, #tpu.memory_space<vmem>>) attributes {dimension_semantics = [#tpu.dimension_semantics<parallel>], iteration_bounds = array<i64: 2>, scalar_prefetch = 0 : i64, scratch_operands = 1 : i64, tpu.core_type = #tpu.core_type<tc>, window_params = [{transform_indices = @transform_0, window_bounds = array<i64: 1, 16, 16, 3>}, {pipeline_mode = #tpu.pipeline_mode<synchronous>, transform_indices = @transform_1, window_bounds = array<i64: 3, 3, 3, 16>}, {pipeline_mode = #tpu.pipeline_mode<synchronous>, transform_indices = @transform_2, window_bounds = array<i64: 1, 1, 16>}, {transform_indices = @transform_3, window_bounds = array<i64: 1, 16, 16, 16>}]} {
    %cst = arith.constant 0.000000e+00 : f32
    %0 = vector.broadcast %cst : f32 to vector<18x18x3xf32>
    %c0 = arith.constant 0 : index
    %c0_0 = arith.constant 0 : index
    %c0_1 = arith.constant 0 : index
    %1 = vector.load %arg5[%c0, %c0_0, %c0_1] : memref<18x18x3xf32, #tpu.memory_space<vmem>>, vector<18x18x3xf32>
    tpu.vector_store %arg5[%c0, %c0_0, %c0_1], %0 {strides = array<i32>} : memref<18x18x3xf32, #tpu.memory_space<vmem>>, vector<18x18x3xf32>,
    %c0_2 = arith.constant 0 : index
    %c0_3 = arith.constant 0 : index
    %c0_4 = arith.constant 0 : index
    %c0_5 = arith.constant 0 : index
    %2 = vector.load %arg1[%c0_2, %c0_3, %c0_4, %c0_5] : memref<1x16x16x3xf32, #tpu.memory_space<vmem>>, vector<1x16x16x3xf32>
    %3 = vector.shape_cast %2 : vector<1x16x16x3xf32> to vector<16x16x3xf32>
    %c1 = arith.constant 1 : index
    %c1_6 = arith.constant 1 : index
    %c0_7 = arith.constant 0 : index
    %4 = vector.load %arg5[%c1, %c1_6, %c0_7] : memref<18x18x3xf32, #tpu.memory_space<vmem>>, vector<16x16x3xf32>
    tpu.vector_store %arg5[%c1, %c1_6, %c0_7], %3 {strides = array<i32>} : memref<18x18x3xf32, #tpu.memory_space<vmem>>, vector<16x16x3xf32>,
    %cst_8 = arith.constant 0.000000e+00 : f32
    %5 = vector.broadcast %cst_8 : f32 to vector<16x16x16xf32>
    %c0_9 = arith.constant 0 : index
    %c0_10 = arith.constant 0 : index
    %c0_11 = arith.constant 0 : index
    %6 = vector.load %arg5[%c0_9, %c0_10, %c0_11] : memref<18x18x3xf32, #tpu.memory_space<vmem>>, vector<16x16x3xf32>
    %c0_12 = arith.constant 0 : index
    %c0_13 = arith.constant 0 : index
    %c0_14 = arith.constant 0 : index
    %c0_15 = arith.constant 0 : index
    %7 = vector.load %arg2[%c0_12, %c0_13, %c0_14, %c0_15] : memref<3x3x3x16xf32, #tpu.memory_space<vmem>>, vector<1x1x3x16xf32>
    %8 = vector.shape_cast %7 : vector<1x1x3x16xf32> to vector<3x16xf32>
    %9 = vector.shape_cast %6 : vector<16x16x3xf32> to vector<256x3xf32>
    %cst_16 = arith.constant dense<0.000000e+00> : vector<256x16xf32>
    %10 = tpu.matmul %9, %8, %cst_16 {dimension_numbers = #tpu.dot_dimension_numbers<[1], [0], [0], [1], [0, 0, 1, 1], [], []>} : vector<256x3xf32>, vector<3x16xf32>, vector<256x16xf32> -> vector<256x16xf32>
    %11 = vector.shape_cast %10 : vector<256x16xf32> to vector<16x16x16xf32>
    %12 = arith.addf %5, %11 : vector<16x16x16xf32>
    %c0_17 = arith.constant 0 : index
    %c1_18 = arith.constant 1 : index
    %c0_19 = arith.constant 0 : index
    %13 = vector.load %arg5[%c0_17, %c1_18, %c0_19] : memref<18x18x3xf32, #tpu.memory_space<vmem>>, vector<16x16x3xf32>
    %c0_20 = arith.constant 0 : index
    %c1_21 = arith.constant 1 : index
    %c0_22 = arith.constant 0 : index
    %c0_23 = arith.constant 0 : index
    %14 = vector.load %arg2[%c0_20, %c1_21, %c0_22, %c0_23] : memref<3x3x3x16xf32, #tpu.memory_space<vmem>>, vector<1x1x3x16xf32>
    %15 = vector.shape_cast %14 : vector<1x1x3x16xf32> to vector<3x16xf32>
    %16 = vector.shape_cast %13 : vector<16x16x3xf32> to vector<256x3xf32>
    %cst_24 = arith.constant dense<0.000000e+00> : vector<256x16xf32>
    %17 = tpu.matmul %16, %15, %cst_24 {dimension_numbers = #tpu.dot_dimension_numbers<[1], [0], [0], [1], [0, 0, 1, 1], [], []>} : vector<256x3xf32>, vector<3x16xf32>, vector<256x16xf32> -> vector<256x16xf32>
    %18 = vector.shape_cast %17 : vector<256x16xf32> to vector<16x16x16xf32>
    %19 = arith.addf %12, %18 : vector<16x16x16xf32>
    %c0_25 = arith.constant 0 : index
    %c2 = arith.constant 2 : index
    %c0_26 = arith.constant 0 : index
    %20 = vector.load %arg5[%c0_25, %c2, %c0_26] : memref<18x18x3xf32, #tpu.memory_space<vmem>>, vector<16x16x3xf32>
    %c0_27 = arith.constant 0 : index
    %c2_28 = arith.constant 2 : index
    %c0_29 = arith.constant 0 : index
    %c0_30 = arith.constant 0 : index
    %21 = vector.load %arg2[%c0_27, %c2_28, %c0_29, %c0_30] : memref<3x3x3x16xf32, #tpu.memory_space<vmem>>, vector<1x1x3x16xf32>
    %22 = vector.shape_cast %21 : vector<1x1x3x16xf32> to vector<3x16xf32>
    %23 = vector.shape_cast %20 : vector<16x16x3xf32> to vector<256x3xf32>
    %cst_31 = arith.constant dense<0.000000e+00> : vector<256x16xf32>
    %24 = tpu.matmul %23, %22, %cst_31 {dimension_numbers = #tpu.dot_dimension_numbers<[1], [0], [0], [1], [0, 0, 1, 1], [], []>} : vector<256x3xf32>, vector<3x16xf32>, vector<256x16xf32> -> vector<256x16xf32>
    %25 = vector.shape_cast %24 : vector<256x16xf32> to vector<16x16x16xf32>
    %26 = arith.addf %19, %25 : vector<16x16x16xf32>
    %c1_32 = arith.constant 1 : index
    %c0_33 = arith.constant 0 : index
    %c0_34 = arith.constant 0 : index
    %27 = vector.load %arg5[%c1_32, %c0_33, %c0_34] : memref<18x18x3xf32, #tpu.memory_space<vmem>>, vector<16x16x3xf32>
    %c1_35 = arith.constant 1 : index
    %c0_36 = arith.constant 0 : index
    %c0_37 = arith.constant 0 : index
    %c0_38 = arith.constant 0 : index
    %28 = vector.load %arg2[%c1_35, %c0_36, %c0_37, %c0_38] : memref<3x3x3x16xf32, #tpu.memory_space<vmem>>, vector<1x1x3x16xf32>
    %29 = vector.shape_cast %28 : vector<1x1x3x16xf32> to vector<3x16xf32>
    %30 = vector.shape_cast %27 : vector<16x16x3xf32> to vector<256x3xf32>
    %cst_39 = arith.constant dense<0.000000e+00> : vector<256x16xf32>
    %31 = tpu.matmul %30, %29, %cst_39 {dimension_numbers = #tpu.dot_dimension_numbers<[1], [0], [0], [1], [0, 0, 1, 1], [], []>} : vector<256x3xf32>, vector<3x16xf32>, vector<256x16xf32> -> vector<256x16xf32>
    %32 = vector.shape_cast %31 : vector<256x16xf32> to vector<16x16x16xf32>
    %33 = arith.addf %26, %32 : vector<16x16x16xf32>
    %c1_40 = arith.constant 1 : index
    %c1_41 = arith.constant 1 : index
    %c0_42 = arith.constant 0 : index
    %34 = vector.load %arg5[%c1_40, %c1_41, %c0_42] : memref<18x18x3xf32, #tpu.memory_space<vmem>>, vector<16x16x3xf32>
    %c1_43 = arith.constant 1 : index
    %c1_44 = arith.constant 1 : index
    %c0_45 = arith.constant 0 : index
    %c0_46 = arith.constant 0 : index
    %35 = vector.load %arg2[%c1_43, %c1_44, %c0_45, %c0_46] : memref<3x3x3x16xf32, #tpu.memory_space<vmem>>, vector<1x1x3x16xf32>
    %36 = vector.shape_cast %35 : vector<1x1x3x16xf32> to vector<3x16xf32>
    %37 = vector.shape_cast %34 : vector<16x16x3xf32> to vector<256x3xf32>
    %cst_47 = arith.constant dense<0.000000e+00> : vector<256x16xf32>
    %38 = tpu.matmul %37, %36, %cst_47 {dimension_numbers = #tpu.dot_dimension_numbers<[1], [0], [0], [1], [0, 0, 1, 1], [], []>} : vector<256x3xf32>, vector<3x16xf32>, vector<256x16xf32> -> vector<256x16xf32>
    %39 = vector.shape_cast %38 : vector<256x16xf32> to vector<16x16x16xf32>
    %40 = arith.addf %33, %39 : vector<16x16x16xf32>
    %c1_48 = arith.constant 1 : index
    %c2_49 = arith.constant 2 : index
    %c0_50 = arith.constant 0 : index
    %41 = vector.load %arg5[%c1_48, %c2_49, %c0_50] : memref<18x18x3xf32, #tpu.memory_space<vmem>>, vector<16x16x3xf32>
    %c1_51 = arith.constant 1 : index
    %c2_52 = arith.constant 2 : index
    %c0_53 = arith.constant 0 : index
    %c0_54 = arith.constant 0 : index
    %42 = vector.load %arg2[%c1_51, %c2_52, %c0_53, %c0_54] : memref<3x3x3x16xf32, #tpu.memory_space<vmem>>, vector<1x1x3x16xf32>
    %43 = vector.shape_cast %42 : vector<1x1x3x16xf32> to vector<3x16xf32>
    %44 = vector.shape_cast %41 : vector<16x16x3xf32> to vector<256x3xf32>
    %cst_55 = arith.constant dense<0.000000e+00> : vector<256x16xf32>
    %45 = tpu.matmul %44, %43, %cst_55 {dimension_numbers = #tpu.dot_dimension_numbers<[1], [0], [0], [1], [0, 0, 1, 1], [], []>} : vector<256x3xf32>, vector<3x16xf32>, vector<256x16xf32> -> vector<256x16xf32>
    %46 = vector.shape_cast %45 : vector<256x16xf32> to vector<16x16x16xf32>
    %47 = arith.addf %40, %46 : vector<16x16x16xf32>
    %c2_56 = arith.constant 2 : index
    %c0_57 = arith.constant 0 : index
    %c0_58 = arith.constant 0 : index
    %48 = vector.load %arg5[%c2_56, %c0_57, %c0_58] : memref<18x18x3xf32, #tpu.memory_space<vmem>>, vector<16x16x3xf32>
    %c2_59 = arith.constant 2 : index
    %c0_60 = arith.constant 0 : index
    %c0_61 = arith.constant 0 : index
    %c0_62 = arith.constant 0 : index
    %49 = vector.load %arg2[%c2_59, %c0_60, %c0_61, %c0_62] : memref<3x3x3x16xf32, #tpu.memory_space<vmem>>, vector<1x1x3x16xf32>
    %50 = vector.shape_cast %49 : vector<1x1x3x16xf32> to vector<3x16xf32>
    %51 = vector.shape_cast %48 : vector<16x16x3xf32> to vector<256x3xf32>
    %cst_63 = arith.constant dense<0.000000e+00> : vector<256x16xf32>
    %52 = tpu.matmul %51, %50, %cst_63 {dimension_numbers = #tpu.dot_dimension_numbers<[1], [0], [0], [1], [0, 0, 1, 1], [], []>} : vector<256x3xf32>, vector<3x16xf32>, vector<256x16xf32> -> vector<256x16xf32>
    %53 = vector.shape_cast %52 : vector<256x16xf32> to vector<16x16x16xf32>
    %54 = arith.addf %47, %53 : vector<16x16x16xf32>
    %c2_64 = arith.constant 2 : index
    %c1_65 = arith.constant 1 : index
    %c0_66 = arith.constant 0 : index
    %55 = vector.load %arg5[%c2_64, %c1_65, %c0_66] : memref<18x18x3xf32, #tpu.memory_space<vmem>>, vector<16x16x3xf32>
    %c2_67 = arith.constant 2 : index
    %c1_68 = arith.constant 1 : index
    %c0_69 = arith.constant 0 : index
    %c0_70 = arith.constant 0 : index
    %56 = vector.load %arg2[%c2_67, %c1_68, %c0_69, %c0_70] : memref<3x3x3x16xf32, #tpu.memory_space<vmem>>, vector<1x1x3x16xf32>
    %57 = vector.shape_cast %56 : vector<1x1x3x16xf32> to vector<3x16xf32>
    %58 = vector.shape_cast %55 : vector<16x16x3xf32> to vector<256x3xf32>
    %cst_71 = arith.constant dense<0.000000e+00> : vector<256x16xf32>
    %59 = tpu.matmul %58, %57, %cst_71 {dimension_numbers = #tpu.dot_dimension_numbers<[1], [0], [0], [1], [0, 0, 1, 1], [], []>} : vector<256x3xf32>, vector<3x16xf32>, vector<256x16xf32> -> vector<256x16xf32>
    %60 = vector.shape_cast %59 : vector<256x16xf32> to vector<16x16x16xf32>
    %61 = arith.addf %54, %60 : vector<16x16x16xf32>
    %c2_72 = arith.constant 2 : index
    %c2_73 = arith.constant 2 : index
    %c0_74 = arith.constant 0 : index
    %62 = vector.load %arg5[%c2_72, %c2_73, %c0_74] : memref<18x18x3xf32, #tpu.memory_space<vmem>>, vector<16x16x3xf32>
    %c2_75 = arith.constant 2 : index
    %c2_76 = arith.constant 2 : index
    %c0_77 = arith.constant 0 : index
    %c0_78 = arith.constant 0 : index
    %63 = vector.load %arg2[%c2_75, %c2_76, %c0_77, %c0_78] : memref<3x3x3x16xf32, #tpu.memory_space<vmem>>, vector<1x1x3x16xf32>
    %64 = vector.shape_cast %63 : vector<1x1x3x16xf32> to vector<3x16xf32>
    %65 = vector.shape_cast %62 : vector<16x16x3xf32> to vector<256x3xf32>
    %cst_79 = arith.constant dense<0.000000e+00> : vector<256x16xf32>
    %66 = tpu.matmul %65, %64, %cst_79 {dimension_numbers = #tpu.dot_dimension_numbers<[1], [0], [0], [1], [0, 0, 1, 1], [], []>} : vector<256x3xf32>, vector<3x16xf32>, vector<256x16xf32> -> vector<256x16xf32>
    %67 = vector.shape_cast %66 : vector<256x16xf32> to vector<16x16x16xf32>
    %68 = arith.addf %61, %67 : vector<16x16x16xf32>
    %c0_80 = arith.constant 0 : index
    %c0_81 = arith.constant 0 : index
    %c0_82 = arith.constant 0 : index
    %69 = vector.load %arg3[%c0_80, %c0_81, %c0_82] : memref<1x1x16xf32, #tpu.memory_space<vmem>>, vector<1x1x16xf32>
    %70 = vector.broadcast %69 : vector<1x1x16xf32> to vector<16x16x16xf32>
    %71 = arith.addf %68, %70 : vector<16x16x16xf32>
    %c0_83 = arith.constant 0 : index
    %c0_84 = arith.constant 0 : index
    %c0_85 = arith.constant 0 : index
    %c0_86 = arith.constant 0 : index
    %72 = vector.load %arg4[%c0_83, %c0_84, %c0_85, %c0_86] : memref<1x16x16x16xf32, #tpu.memory_space<vmem>>, vector<1x16x16x16xf32>
    %73 = vector.shape_cast %72 : vector<1x16x16x16xf32> to vector<16x16x16xf32>
    %74 = vector.shape_cast %71 : vector<16x16x16xf32> to vector<1x16x16x16xf32>
    tpu.vector_store %arg4[%c0_83, %c0_84, %c0_85, %c0_86], %74 {strides = array<i32>} : memref<1x16x16x16xf32, #tpu.memory_space<vmem>>, vector<1x16x16x16xf32>,
    return
  }
  func.func @transform_0(%arg0: i32) -> (i32, i32, i32, i32) {
    %c0_i32 = arith.constant 0 : i32
    %c0_i32_0 = arith.constant 0 : i32
    %c0_i32_1 = arith.constant 0 : i32
    %c0_i32_2 = arith.constant 0 : i32
    return %arg0, %c0_i32, %c0_i32_0, %c0_i32_1 : i32, i32, i32, i32
  }
  func.func @transform_1(%arg0: i32) -> (i32, i32, i32, i32) {
    %c0_i32 = arith.constant 0 : i32
    %c0_i32_0 = arith.constant 0 : i32
    %c0_i32_1 = arith.constant 0 : i32
    %c0_i32_2 = arith.constant 0 : i32
    %c0_i32_3 = arith.constant 0 : i32
    return %c0_i32, %c0_i32_0, %c0_i32_1, %c0_i32_2 : i32, i32, i32, i32
  }
  func.func @transform_2(%arg0: i32) -> (i32, i32, i32) {
    %c0_i32 = arith.constant 0 : i32
    %c0_i32_0 = arith.constant 0 : i32
    %c0_i32_1 = arith.constant 0 : i32
    %c0_i32_2 = arith.constant 0 : i32
    return %c0_i32, %c0_i32_0, %c0_i32_1 : i32, i32, i32
  }
  func.func @transform_3(%arg0: i32) -> (i32, i32, i32, i32) {
    %c0_i32 = arith.constant 0 : i32
    %c0_i32_0 = arith.constant 0 : i32
    %c0_i32_1 = arith.constant 0 : i32
    %c0_i32_2 = arith.constant 0 : i32
    return %arg0, %c0_i32, %c0_i32_0, %c0_i32_1 : i32, i32, i32, i32
  }
}

</mosaic_0001>

<bundles_post_ra>
// kernel: tpu_custom_call.1
= control target key start
LH: loop header
LB: loop body
LE: loop exit
PB: predicated region body
PF: predicated region fallthrough
CT: control target
= control target key end

     0   :  { %vm142_vm0 = vcmask 1042432   ;;  %vm45_vm1 = vcmask 23552   ;;  %s758_s0 = inlined_call_operand.vmem [shape: f32[16,16,3], index: 0, kind: input, shape index: {}]   ;;  %s759_s1 = inlined_call_operand.vmem [shape: f32[3,16], index: 1, kind: input, shape index: {}]   ;;  %s760_s2 = inlined_call_operand.hbm [shape: f32[16,16,16], index: 2, kind: output, shape index: {}]  }
   0x1   :  { %v44_v0 = vld [vmem:[%s759_s1] sm:$0x7]  ;;  %v13_v3 = vld [vmem:[%s758_s0 + $0x8] sm:$0xff]  ;;  %v14_v5 = vld [vmem:[%s758_s0 + $0x10] sm:$0xff] }
   0x2   :  { %v12_v1 = vld [vmem:[%s758_s0] sm:$0xff]  ;;  %486 = vmatprep.subr.msk.mxu0 %vm142_vm0, %v44_v0  ;;  %536 = vmatprep.subr.msk.mxu1 %vm142_vm0, %v44_v0  ;;  %v29_v4 = vld [vmem:[%s758_s0 + $0x88] sm:$0xff]  ;;  %v30_v6 = vld [vmem:[%s758_s0 + $0x90] sm:$0xff] }
   0x3   :  { %v28_v2 = vld [vmem:[%s758_s0 + $0x80] sm:$0xff]  ;;  %487 = vmatpush3.msk.msra.mxu0 %vm142_vm0, %v44_v0  ;;  %537 = vmatpush3.msk.msra.mxu1 %vm142_vm0, %v44_v0  ;;  %v15_v7 = vld [vmem:[%s758_s0 + $0x18] sm:$0xff]  ;;  %v17_v11 = vld [vmem:[%s758_s0 + $0x28] sm:$0xff] }
   0x4   :  { %488 = vmatprep.mubr.msk.f32.mxu0 %vm45_vm1, %v12_v1  ;;  %512 = vmatprep.mubr.msk.f32.mxu1 %vm45_vm1, %v28_v2  ;;  %v31_v8 = vld [vmem:[%s758_s0 + $0x98] sm:$0xff]  ;;  %v16_v9 = vld [vmem:[%s758_s0 + $0x20] sm:$0xff]  ;;  %v33_v12 = vld [vmem:[%s758_s0 + $0xa8] sm:$0xff] }
   0x5   :  { %489 = vmatmul.mubr.msk.f32.vlgmr.msra.gmra.mrb[0].mxu0 %vm45_vm1, %v13_v3  ;;  %513 = vmatmul.mubr.msk.f32.vlgmr.msra.gmra.mrb[0].mxu1 %vm45_vm1, %v29_v4  ;;  %v32_v10 = vld [vmem:[%s758_s0 + $0xa0] sm:$0xff]  ;;  %v18_v13 = vld [vmem:[%s758_s0 + $0x30] sm:$0xff] }
   0x6   :  { %491 = vmatprep.mubr.msk.f32.mxu0 %vm45_vm1, %v14_v5  ;;  %515 = vmatprep.mubr.msk.f32.mxu1 %vm45_vm1, %v30_v6  ;;  %v34_v14 = vld [vmem:[%s758_s0 + $0xb0] sm:$0xff] }
   0x9   :  { %492 = vmatmul.mubr.msk.f32.gmra.mrb[2].mxu0 %vm45_vm1, %v15_v7  ;;  %516 = vmatmul.mubr.msk.f32.gmra.mrb[2].mxu1 %vm45_vm1, %v31_v8 }
   0xa   :  { %494 = vmatprep.mubr.msk.f32.mxu0 %vm45_vm1, %v16_v9  ;;  %518 = vmatprep.mubr.msk.f32.mxu1 %vm45_vm1, %v32_v10 }
   0xb   :  { %7 = vsyncpa [#allocation3], 0  ;;  %v19_v15 = vld [vmem:[%s758_s0 + $0x38] sm:$0xff]  ;;  %v20_v17 = vld [vmem:[%s758_s0 + $0x40] sm:$0xff]  ;;  %vm371_vm2 = vcmask 130048  }
   0xc   :  { %v35_v16 = vld [vmem:[%s758_s0 + $0xb8] sm:$0xff]  ;;  %v36_v18 = vld [vmem:[%s758_s0 + $0xc0] sm:$0xff]  ;;  %v21_v19 = vld [vmem:[%s758_s0 + $0x48] sm:$0xff] }
   0xd   :  { %495 = vmatmul.mubr.msk.f32.gmra.mrb[4].mxu0 %vm45_vm1, %v17_v11  ;;  %519 = vmatmul.mubr.msk.f32.gmra.mrb[4].mxu1 %vm45_vm1, %v33_v12  ;;  %v37_v20 = vld [vmem:[%s758_s0 + $0xc8] sm:$0xff]  ;;  %v22_v21 = vld [vmem:[%s758_s0 + $0x50] sm:$0xff]  ;;  %v23_v23 = vld [vmem:[%s758_s0 + $0x58] sm:$0xff] }
   0xe   :  { %497 = vmatprep.mubr.msk.f32.mxu0 %vm45_vm1, %v18_v13  ;;  %521 = vmatprep.mubr.msk.f32.mxu1 %vm45_vm1, %v34_v14  ;;  %v38_v22 = vld [vmem:[%s758_s0 + $0xd0] sm:$0xff]  ;;  %v39_v24 = vld [vmem:[%s758_s0 + $0xd8] sm:$0xff]  ;;  %v24_v25 = vld [vmem:[%s758_s0 + $0x60] sm:$0xff] }
   0xf   :  { %v40_v26 = vld [vmem:[%s758_s0 + $0xe0] sm:$0xff]  ;;  %v25_v27 = vld [vmem:[%s758_s0 + $0x68] sm:$0xff]  ;;  %v26_v29 = vld [vmem:[%s758_s0 + $0x70] sm:$0xff] }
  0x10   :  { %v41_v28 = vld [vmem:[%s758_s0 + $0xe8] sm:$0xff]  ;;  %v42_v30 = vld [vmem:[%s758_s0 + $0xf0] sm:$0xff]  ;;  %v27_v31 = vld [vmem:[%s758_s0 + $0x78] sm:$0xff] }
  0x11   :  { %498 = vmatmul.mubr.msk.f32.gmra.mrb[6].mxu0 %vm45_vm1, %v19_v15  ;;  %522 = vmatmul.mubr.msk.f32.gmra.mrb[6].mxu1 %vm45_vm1, %v35_v16  ;;  %v43_v32 = vld [vmem:[%s758_s0 + $0xf8] sm:$0xff]  ;;  %s565_s0 = smov [#allocation2]  }
  0x12   :  { %500 = vmatprep.mubr.msk.f32.mxu0 %vm45_vm1, %v20_v17  ;;  %524 = vmatprep.mubr.msk.f32.mxu1 %vm45_vm1, %v36_v18  ;;  %s409_s17 = sshll.u32 %s565_s0, 4  ;;  %s410_s17 = int_to_ptr.vmem [resolvable:$true] %s409_s17 }
  0x13   :  { %s541_s18 = scalar_lea.vmem %s410_s17, 4096  ;;  %p546_p1 = scmp.lt.s32.totalorder %s410_s17, %s410_s17 }
  0x14   :  { %p542_p0 = scmp.ne.s32.totalorder %s410_s17, %s541_s18  ;;  %p547_p2 = scmp.lt.s32.totalorder %s541_s18, %s541_s18 }
  0x15   :  { %501 = vmatmul.mubr.msk.f32.gmra.mrb[8].mxu0 %vm45_vm1, %v21_v19  ;;  %525 = vmatmul.mubr.msk.f32.gmra.mrb[8].mxu1 %vm45_vm1, %v37_v20 }
  0x16   :  { %503 = vmatprep.mubr.msk.f32.mxu0 %vm45_vm1, %v22_v21  ;;  %527 = vmatprep.mubr.msk.f32.mxu1 %vm45_vm1, %v38_v22  ;;  %p548_p3 = por %p547_p2, %p546_p1 }
  0x18   :  { %p549_p4 = pnand %p548_p3, %p542_p0 }
  0x19   :  { %504 = vmatmul.mubr.msk.f32.gmra.mrb[10].mxu0 %vm45_vm1, %v23_v23  ;;  %528 = vmatmul.mubr.msk.f32.gmra.mrb[10].mxu1 %vm45_vm1, %v39_v24 }
  0x1a   :  { %506 = vmatprep.mubr.msk.f32.mxu0 %vm45_vm1, %v24_v25  ;;  %530 = vmatprep.mubr.msk.f32.mxu1 %vm45_vm1, %v40_v26 }
  0x1d   :  { %507 = vmatmul.mubr.msk.f32.gmra.mrb[12].mxu0 %vm45_vm1, %v25_v27  ;;  %531 = vmatmul.mubr.msk.f32.gmra.mrb[12].mxu1 %vm45_vm1, %v41_v28 }
  0x1e   :  { %509 = vmatprep.mubr.msk.f32.mxu0 %vm45_vm1, %v26_v29  ;;  %533 = vmatprep.mubr.msk.f32.mxu1 %vm45_vm1, %v42_v30 }
  0x21   :  { %510 = vmatmul.mubr.msk.f32.gmra.mrb[14].mxu0 %vm45_vm1, %v27_v31  ;;  %534 = vmatmul.mubr.msk.f32.gmra.mrb[14].mxu1 %vm45_vm1, %v43_v32 }
  0xd8   :  { %v490_v33 = vpop.f32.mrb[0].mxu0  ;;  %v514_v34 = vpop.f32.mrb[0].mxu1 }
  0xd9   :  { %373 = vst.msk [vmem:[#allocation2 + $0x8] sm:$0xff] %vm371_vm2, %v490_v33  ;;  %389 = vst.msk [vmem:[#allocation2 + $0x88] sm:$0xff] %vm371_vm2, %v514_v34  ;;  %v212_v35 = vpop.f32.mrb[1].mxu0  ;;  %v292_v36 = vpop.f32.mrb[1].mxu1 }
  0xda   :  { %372 = vst.msk [vmem:[#allocation2] sm:$0xff] %vm371_vm2, %v212_v35  ;;  %388 = vst.msk [vmem:[#allocation2 + $0x80] sm:$0xff] %vm371_vm2, %v292_v36 }
  0xdc   :  { %v493_v37 = vpop.f32.mrb[2].mxu0  ;;  %v517_v38 = vpop.f32.mrb[2].mxu1 }
  0xdd   :  { %375 = vst.msk [vmem:[#allocation2 + $0x18] sm:$0xff] %vm371_vm2, %v493_v37  ;;  %391 = vst.msk [vmem:[#allocation2 + $0x98] sm:$0xff] %vm371_vm2, %v517_v38  ;;  %v222_v39 = vpop.f32.mrb[3].mxu0  ;;  %v302_v40 = vpop.f32.mrb[3].mxu1 }
  0xde   :  { %374 = vst.msk [vmem:[#allocation2 + $0x10] sm:$0xff] %vm371_vm2, %v222_v39  ;;  %390 = vst.msk [vmem:[#allocation2 + $0x90] sm:$0xff] %vm371_vm2, %v302_v40 }
  0xe0   :  { %v496_v41 = vpop.f32.mrb[4].mxu0  ;;  %v520_v42 = vpop.f32.mrb[4].mxu1 }
  0xe1   :  { %377 = vst.msk [vmem:[#allocation2 + $0x28] sm:$0xff] %vm371_vm2, %v496_v41  ;;  %393 = vst.msk [vmem:[#allocation2 + $0xa8] sm:$0xff] %vm371_vm2, %v520_v42  ;;  %v232_v43 = vpop.f32.mrb[5].mxu0  ;;  %v312_v44 = vpop.f32.mrb[5].mxu1 }
  0xe2   :  { %376 = vst.msk [vmem:[#allocation2 + $0x20] sm:$0xff] %vm371_vm2, %v232_v43  ;;  %392 = vst.msk [vmem:[#allocation2 + $0xa0] sm:$0xff] %vm371_vm2, %v312_v44 }
  0xe4   :  { %v499_v45 = vpop.f32.mrb[6].mxu0  ;;  %v523_v46 = vpop.f32.mrb[6].mxu1 }
  0xe5   :  { %379 = vst.msk [vmem:[#allocation2 + $0x38] sm:$0xff] %vm371_vm2, %v499_v45  ;;  %395 = vst.msk [vmem:[#allocation2 + $0xb8] sm:$0xff] %vm371_vm2, %v523_v46  ;;  %v242_v47 = vpop.f32.mrb[7].mxu0  ;;  %v322_v48 = vpop.f32.mrb[7].mxu1 }
  0xe6   :  { %378 = vst.msk [vmem:[#allocation2 + $0x30] sm:$0xff] %vm371_vm2, %v242_v47  ;;  %394 = vst.msk [vmem:[#allocation2 + $0xb0] sm:$0xff] %vm371_vm2, %v322_v48 }
  0xe8   :  { %v502_v49 = vpop.f32.mrb[8].mxu0  ;;  %v526_v50 = vpop.f32.mrb[8].mxu1 }
  0xe9   :  { %381 = vst.msk [vmem:[#allocation2 + $0x48] sm:$0xff] %vm371_vm2, %v502_v49  ;;  %397 = vst.msk [vmem:[#allocation2 + $0xc8] sm:$0xff] %vm371_vm2, %v526_v50  ;;  %v252_v51 = vpop.f32.mrb[9].mxu0  ;;  %v332_v52 = vpop.f32.mrb[9].mxu1 }
  0xea   :  { %380 = vst.msk [vmem:[#allocation2 + $0x40] sm:$0xff] %vm371_vm2, %v252_v51  ;;  %396 = vst.msk [vmem:[#allocation2 + $0xc0] sm:$0xff] %vm371_vm2, %v332_v52 }
  0xec   :  { %v505_v53 = vpop.f32.mrb[10].mxu0  ;;  %v529_v54 = vpop.f32.mrb[10].mxu1 }
  0xed   :  { %383 = vst.msk [vmem:[#allocation2 + $0x58] sm:$0xff] %vm371_vm2, %v505_v53  ;;  %399 = vst.msk [vmem:[#allocation2 + $0xd8] sm:$0xff] %vm371_vm2, %v529_v54  ;;  %v262_v55 = vpop.f32.mrb[11].mxu0  ;;  %v342_v56 = vpop.f32.mrb[11].mxu1 }
  0xee   :  { %382 = vst.msk [vmem:[#allocation2 + $0x50] sm:$0xff] %vm371_vm2, %v262_v55  ;;  %398 = vst.msk [vmem:[#allocation2 + $0xd0] sm:$0xff] %vm371_vm2, %v342_v56 }
  0xf0   :  { %v508_v57 = vpop.f32.mrb[12].mxu0  ;;  %v532_v58 = vpop.f32.mrb[12].mxu1 }
  0xf1   :  { %385 = vst.msk [vmem:[#allocation2 + $0x68] sm:$0xff] %vm371_vm2, %v508_v57  ;;  %401 = vst.msk [vmem:[#allocation2 + $0xe8] sm:$0xff] %vm371_vm2, %v532_v58  ;;  %v272_v59 = vpop.f32.mrb[13].mxu0  ;;  %v352_v60 = vpop.f32.mrb[13].mxu1 }
  0xf2   :  { %384 = vst.msk [vmem:[#allocation2 + $0x60] sm:$0xff] %vm371_vm2, %v272_v59  ;;  %400 = vst.msk [vmem:[#allocation2 + $0xe0] sm:$0xff] %vm371_vm2, %v352_v60 }
  0xf4   :  { %v511_v61 = vpop.f32.mrb[14].mxu0  ;;  %v535_v62 = vpop.f32.mrb[14].mxu1 }
  0xf5   :  { %387 = vst.msk [vmem:[#allocation2 + $0x78] sm:$0xff] %vm371_vm2, %v511_v61  ;;  %403 = vst.msk [vmem:[#allocation2 + $0xf8] sm:$0xff] %vm371_vm2, %v535_v62  ;;  %v282_v63 = vpop.f32.mrb[15].mxu0  ;;  %v362_v0 = vpop.f32.mrb[15].mxu1 }
  0xf6   :  { %386 = vst.msk [vmem:[#allocation2 + $0x70] sm:$0xff] %vm371_vm2, %v282_v63  ;;  %402 = vst.msk [vmem:[#allocation2 + $0xf0] sm:$0xff] %vm371_vm2, %v362_v0 }
  0xf7   :  { %552 = shalt.err (!%p549_p4)
}
  0xf8   :  { %s553_s20 = scalar_lea.hbm %s760_s2, 4096 }
  0xf9   :  { %p554_p5 = scmp.ne.s32.totalorder %s760_s2, %s553_s20  ;;  %p557_p6 = scmp.lt.u32.totalorder %s553_s20, %s760_s2 }
  0xfb   :  { %p559_p7 = pnand %p557_p6, %p554_p5 }
  0xfd   :  { %562 = shalt.err (!%p559_p7)
}
  0xfe   :  { %s566_s25 = smov 128   ;;  %s567_s26 = smov 8  }
  0xff   :  { %415 = dma.vmem_to_hbm [thread:$0]  %s410_s17, 4096, %s760_s2, [#allocation3], %s566_s25, %s566_s25, %s567_s26  }
 0x100   :  { %563 = dma.done.wait [#allocation3], 4096  }
 0x101   :  { %564 = vsyncadd [#allocation3], 4294963200 }
 0x102   :  { %419 = vsyncpa [#allocation3], 1 }

// kernel: tpu_custom_call.1
= control target key start
LH: loop header
LB: loop body
LE: loop exit
PB: predicated region body
PF: predicated region fallthrough
CT: control target
= control target key end

     0   :  { %8 = vsyncpa [#allocation4], 0  ;;  %s6630_s0 = inlined_call_operand.vmem [shape: f32[2,16,16,3], index: 0, kind: input, shape index: {}]   ;;  %s6631_s1 = inlined_call_operand.vmem [shape: f32[3,3,3,16], index: 1, kind: input, shape index: {}]   ;;  %s6632_s2 = inlined_call_operand.vmem [shape: f32[1,1,16], index: 2, kind: input, shape index: {}]   ;;  %s6633_s3 = inlined_call_operand.hbm [shape: f32[2,16,16,16], index: 3, kind: output, shape index: {}]  }
   0x1   :  { %10 = vsyncpa [#allocation4 + $0x1], 0  ;;  %s5404_s12 = smov 0   ;;  %s5406_s13 = smov 0  }
   0x2   :  { %s5408_s14 = smov 0   ;;  %s5410_s15 = smov 0  }
   0x3 LB: > { %s5425_s16 = sadd.s32 4294967295, %s5378_s15   ;;  %s3949_s17 = sadd.s32 4294967294, %s5378_s15   ;;  %s5378_s15 = sphi %s5410_s15, %s6753_s15   ;;  %s5374_s14 = sphi %s5408_s14, %s6752_s14   ;;  %s5370_s13 = sphi %s5406_s13, %s6751_s13   ;;  %s5366_s12 = sphi %s5404_s12, %s6750_s12  }
   0x4   : > { %s5429_s18 = sadd.s32 1, %s5378_s15   ;;  %s91_s19 = sadd.s32 1, %s5374_s14 }
   0x5   : > { %s88_s20 = ssub.s32 %s5378_s15, %s5429_s18  ;;  %p101_p0 = scmp.ne.s32.totalorder %s5374_s14, %s5370_s13 }
   0x6   : > { %p89_p1 = scmp.eq.s32.totalorder %s88_s20, 0  ;;  %p102_p2 = scmp.eq.s32.totalorder %s5425_s16, 1 }
   0x7   : > { %p107_p3 = scmp.ne.s32.totalorder %s5370_s13, %s5366_s12  ;;  %p108_p4 = scmp.eq.s32.totalorder %s3949_s17, 1 }
   0x8   : > { %s5440_s21 = scalar_select %p89_p1, %s5374_s14, %s91_s19  }
   0x9   : > { %p5442_p5 = por %p102_p2, %p101_p0  ;;  %p5446_p6 = por %p108_p4, %p107_p3 }
   0xa   : > { %p3952_p7 = scmp.ge.s32.totalorder %s5378_s15, 1  ;;  %p140_p8 = scmp.lt.s32.totalorder %s5378_s15, 3 }
   0xc   : > { %p141_p9 = pnand %p3952_p7, %p140_p8 }
   0xe   : > { %144 = sbr.rel (%p141_p9) target bundleno = 575 (0x23f), region = 32 }
  0x15   : > { %v322_v0 = vld [vmem:[%s6631_s1] sm:$0x7]  ;;  %vm419_vm0 = vcmask 1042432   ;;  %vm169_vm1 = vcmask 23552   ;;  %p164_p10 = scmp.lt.s32.totalorder %s5425_s16, 1  ;;  %v5380_v1 = vmov 0.0  }
  0x16   : > { %4566 = vmatprep.subr.msk.mxu1 %vm419_vm0, %v322_v0  ;;  %170 = vst.msk [vmem:[#allocation2] sm:$0xff] %vm169_vm1, %v5380_v1  ;;  %171 = vst.msk [vmem:[#allocation2 + $0x8] sm:$0xff] %vm169_vm1, %v5380_v1  ;;  %v5532_v2 = vld [vmem:[%s6631_s1 + $0x10] sm:$0x7]  ;;  %v3989_v3 = vld [vmem:[%s6631_s1 + $0x4] sm:$0x7] }
  0x17   : > { %174 = vst.msk [vmem:[#allocation2 + $0x18] sm:$0xff] %vm169_vm1, %v5380_v1  ;;  %175 = vst.msk [vmem:[#allocation2 + $0x20] sm:$0xff] %vm169_vm1, %v5380_v1  ;;  %v5540_v4 = vld [vmem:[%s6631_s1 + $0x14] sm:$0x7]  ;;  %4567 = vmatpush3.msk.msra.mxu1 %vm419_vm0, %v322_v0  ;;  %4766 = vmatprep.subr.msk.mxu0 %vm419_vm0, %v5532_v2  ;;  %s165_s5 = scalar_select %p164_p10, %s5425_s16, 1  ;;  %vm172_vm2 = vcmask 17408  }
  0x18   : > { %177 = vst.msk [vmem:[#allocation2 + $0x30] sm:$0xff] %vm169_vm1, %v5380_v1  ;;  %178 = vst.msk [vmem:[#allocation2 + $0x38] sm:$0xff] %vm169_vm1, %v5380_v1  ;;  %4767 = vmatpush3.msk.msra.mxu0 %vm419_vm0, %v5532_v2  ;;  %4616 = vmatprep.subr.msk.mxu1 %vm419_vm0, %v3989_v3  ;;  %v5606_v11 = vld [vmem:[%s6631_s1 + $0x8] sm:$0x7]  ;;  %v5643_v27 = vld [vmem:[%s6631_s1 + $0x18] sm:$0x7] }
  0x19   : > { %180 = vst.msk [vmem:[#allocation2 + $0x48] sm:$0xff] %vm169_vm1, %v5380_v1  ;;  %181 = vst.msk [vmem:[#allocation2 + $0x50] sm:$0xff] %vm169_vm1, %v5380_v1  ;;  %s4267_s6 = sshll.u32 %s165_s5, 8  ;;  %4816 = vmatprep.subr.msk.mxu0 %vm419_vm0, %v5540_v4  ;;  %s161_s29 = sand.u32 1, %s5370_s13   ;;  %vm3840_vm3 = vcmask 130048  }
  0x1a   : > { %183 = vst.msk [vmem:[#allocation2 + $0x60] sm:$0xff] %vm169_vm1, %v5380_v1  ;;  %184 = vst.msk [vmem:[#allocation2 + $0x68] sm:$0xff] %vm169_vm1, %v5380_v1  ;;  %s5592_s9 = scalar_lea.vmem %s6630_s0, %s4267_s6  ;;  %s3953_s30 = sshll.u32 %s161_s29, 8 }
  0x1b   : > { %186 = vst.msk [vmem:[#allocation2 + $0x78] sm:$0xff] %vm169_vm1, %v5380_v1  ;;  %187 = vst.msk [vmem:[#allocation2 + $0x80] sm:$0xff] %vm169_vm1, %v5380_v1  ;;  %v225_v5 = vld [vmem:[%s5592_s9] sm:$0xff]  ;;  %v226_v6 = vld [vmem:[%s5592_s9 + $0x8] sm:$0xff]  ;;  %s6480_s6 = scalar_lea.vmem [#allocation3], %s3953_s30  ;;  %s4268_s7 = sshll.u32 %s5425_s16, 12 }
  0x1c   : > { %189 = vst.msk [vmem:[#allocation2 + $0x90] sm:$0xff] %vm169_vm1, %v5380_v1  ;;  %190 = vst.msk [vmem:[#allocation2 + $0x98] sm:$0xff] %vm169_vm1, %v5380_v1  ;;  %v227_v7 = vld [vmem:[%s5592_s9 + $0x10] sm:$0xff]  ;;  %v228_v8 = vld [vmem:[%s5592_s9 + $0x18] sm:$0xff]  ;;  %s3887_s8 = sshll.u32 %s6480_s6, 4  ;;  %s6578_s11 = scalar_lea.hbm %s6633_s3, %s4268_s7  ;;  %s6580_s8 = int_to_ptr.vmem [resolvable:$true] %s3887_s8 }
  0x1d   : > { %192 = vst.msk [vmem:[#allocation2 + $0xa8] sm:$0xff] %vm169_vm1, %v5380_v1  ;;  %193 = vst.msk [vmem:[#allocation2 + $0xb0] sm:$0xff] %vm169_vm1, %v5380_v1  ;;  %v229_v9 = vld [vmem:[%s5592_s9 + $0x20] sm:$0xff]  ;;  %v230_v10 = vld [vmem:[%s5592_s9 + $0x28] sm:$0xff]  ;;  %s6589_s16 = scalar_lea.sflag [#allocation4], %s161_s29  ;;  %s5316_s17 = scalar_lea.vmem %s6580_s8, 4096 }
  0x1e   : > { %195 = vst.msk [vmem:[#allocation2 + $0xc0] sm:$0xff] %vm169_vm1, %v5380_v1  ;;  %196 = vst.msk [vmem:[#allocation2 + $0xc8] sm:$0xff] %vm169_vm1, %v5380_v1  ;;  %v290_v12 = vld [vmem:[#allocation2] sm:$0xff]  ;;  %v291_v13 = vld [vmem:[#allocation2 + $0x8] sm:$0xff]  ;;  %p5317_p11 = scmp.ne.s32.totalorder %s6580_s8, %s5316_s17  ;;  %s5381_s19 = smov [#allocation3]  }
  0x1f   : > { %198 = vst.msk [vmem:[#allocation2 + $0xd8] sm:$0xff] %vm169_vm1, %v5380_v1  ;;  %199 = vst.msk [vmem:[#allocation2 + $0xe0] sm:$0xff] %vm169_vm1, %v5380_v1  ;;  %v231_v14 = vld [vmem:[%s5592_s9 + $0x30] sm:$0xff]  ;;  %4568 = vmatprep.mubr.msk.f32.mxu1 %vm169_vm1, %v290_v12  ;;  %v232_v15 = vld [vmem:[%s5592_s9 + $0x38] sm:$0xff]  ;;  %s5320_s20 = sshll.u32 %s5381_s19, 4  ;;  %s5321_s20 = int_to_ptr.vmem [resolvable:$false] %s5320_s20 }
  0x20   : > { %201 = vst.msk [vmem:[#allocation2 + $0xf0] sm:$0xff] %vm169_vm1, %v5380_v1  ;;  %202 = vst.msk [vmem:[#allocation2 + $0xf8] sm:$0xff] %vm169_vm1, %v5380_v1  ;;  %v233_v16 = vld [vmem:[%s5592_s9 + $0x40] sm:$0xff]  ;;  %v234_v17 = vld [vmem:[%s5592_s9 + $0x48] sm:$0xff]  ;;  %4569 = vmatmul.mubr.msk.f32.vlgmr.msra.gmra.mrb[0].mxu1 %vm169_vm1, %v291_v13  ;;  %p5318_p12 = pnand %p5317_p11, %p5442_p5  ;;  %s5322_s24 = scalar_lea.vmem %s5321_s20, 8192 }
  0x21   : > { %204 = vst.msk [vmem:[#allocation2 + $0x108] sm:$0xff] %vm169_vm1, %v5380_v1  ;;  %205 = vst.msk [vmem:[#allocation2 + $0x110] sm:$0xff] %vm169_vm1, %v5380_v1  ;;  %v235_v18 = vld [vmem:[%s5592_s9 + $0x50] sm:$0xff]  ;;  %v236_v19 = vld [vmem:[%s5592_s9 + $0x58] sm:$0xff]  ;;  %4617 = vmatpush3.msk.msra.mxu1 %vm419_vm0, %v3989_v3  ;;  %p5323_p0 = scmp.lt.s32.totalorder %s6580_s8, %s5321_s20  ;;  %p5324_p1 = scmp.lt.s32.totalorder %s5322_s24, %s5316_s17 }
  0x22   : > { %207 = vst.msk [vmem:[#allocation2 + $0x120] sm:$0xff] %vm169_vm1, %v5380_v1  ;;  %208 = vst.msk [vmem:[#allocation2 + $0x128] sm:$0xff] %vm169_vm1, %v5380_v1  ;;  %v237_v20 = vld [vmem:[%s5592_s9 + $0x60] sm:$0xff]  ;;  %v238_v21 = vld [vmem:[%s5592_s9 + $0x68] sm:$0xff]  ;;  %4666 = vmatprep.subr.msk.mxu1 %vm419_vm0, %v5606_v11  ;;  %p5319_p13 = pneg %p5318_p12 }
  0x23   : > { %210 = vst.msk [vmem:[#allocation2 + $0x138] sm:$0xff] %vm169_vm1, %v5380_v1  ;;  %211 = vst.msk [vmem:[#allocation2 + $0x140] sm:$0xff] %vm169_vm1, %v5380_v1  ;;  %v239_v22 = vld [vmem:[%s5592_s9 + $0x70] sm:$0xff]  ;;  %v240_v23 = vld [vmem:[%s5592_s9 + $0x78] sm:$0xff]  ;;  %p5325_p2 = por %p5324_p1, %p5323_p0 }
  0x24   : > { %213 = vst.msk [vmem:[#allocation2 + $0x150] sm:$0xff] %vm169_vm1, %v5380_v1  ;;  %214 = vst.msk [vmem:[#allocation2 + $0x158] sm:$0xff] %vm169_vm1, %v5380_v1  ;;  %v241_v24 = vld [vmem:[%s5592_s9 + $0x80] sm:$0xff]  ;;  %v242_v25 = vld [vmem:[%s5592_s9 + $0x88] sm:$0xff] }
  0x25   : > { %216 = vst.msk [vmem:[#allocation2 + $0x168] sm:$0xff] %vm169_vm1, %v5380_v1  ;;  %217 = vst.msk [vmem:[#allocation2 + $0x170] sm:$0xff] %vm169_vm1, %v5380_v1  ;;  %v243_v26 = vld [vmem:[%s5592_s9 + $0x90] sm:$0xff]  ;;  %v244_v28 = vld [vmem:[%s5592_s9 + $0x98] sm:$0xff]  ;;  %p5326_p3 = pnand %p5325_p2, %p5319_p13 }
  0x26   : > { %219 = vst.msk [vmem:[#allocation2 + $0x180] sm:$0xff] %vm169_vm1, %v5380_v1  ;;  %220 = vst.msk [vmem:[#allocation2 + $0x188] sm:$0xff] %vm169_vm1, %v5380_v1  ;;  %v245_v29 = vld [vmem:[%s5592_s9 + $0xa0] sm:$0xff]  ;;  %v246_v30 = vld [vmem:[%s5592_s9 + $0xa8] sm:$0xff] }
  0x27   : > { %222 = vst.msk [vmem:[#allocation2 + $0x198] sm:$0xff] %vm169_vm1, %v5380_v1  ;;  %223 = vst.msk [vmem:[#allocation2 + $0x1a0] sm:$0xff] %vm169_vm1, %v5380_v1  ;;  %v247_v50 = vld [vmem:[%s5592_s9 + $0xb0] sm:$0xff]  ;;  %v248_v53 = vld [vmem:[%s5592_s9 + $0xb8] sm:$0xff] }
  0x28   : > { %176 = vst.msk [vmem:[#allocation2 + $0x28] sm:$0x3] %vm172_vm2, %v5380_v1  ;;  %173 = vst.msk [vmem:[#allocation2 + $0x10] sm:$0x3] %vm172_vm2, %v5380_v1  ;;  %v249_v55 = vld [vmem:[%s5592_s9 + $0xc0] sm:$0xff]  ;;  %v250_v56 = vld [vmem:[%s5592_s9 + $0xc8] sm:$0xff] }
  0x29   : > { %179 = vst.msk [vmem:[#allocation2 + $0x40] sm:$0x3] %vm172_vm2, %v5380_v1  ;;  %182 = vst.msk [vmem:[#allocation2 + $0x58] sm:$0x3] %vm172_vm2, %v5380_v1  ;;  %v251_v57 = vld [vmem:[%s5592_s9 + $0xd0] sm:$0xff]  ;;  %v252_v58 = vld [vmem:[%s5592_s9 + $0xd8] sm:$0xff] }
  0x2a   : > { %185 = vst.msk [vmem:[#allocation2 + $0x70] sm:$0x3] %vm172_vm2, %v5380_v1  ;;  %188 = vst.msk [vmem:[#allocation2 + $0x88] sm:$0x3] %vm172_vm2, %v5380_v1  ;;  %v253_v59 = vld [vmem:[%s5592_s9 + $0xe0] sm:$0xff]  ;;  %v254_v62 = vld [vmem:[%s5592_s9 + $0xe8] sm:$0xff] }
  0x2b   : > { %191 = vst.msk [vmem:[#allocation2 + $0xa0] sm:$0x3] %vm172_vm2, %v5380_v1  ;;  %194 = vst.msk [vmem:[#allocation2 + $0xb8] sm:$0x3] %vm172_vm2, %v5380_v1  ;;  %v256_v12 = vld [vmem:[%s5592_s9 + $0xf8] sm:$0xff] }
  0x2c   : > { %197 = vst.msk [vmem:[#allocation2 + $0xd0] sm:$0x3] %vm172_vm2, %v5380_v1  ;;  %200 = vst.msk [vmem:[#allocation2 + $0xe8] sm:$0x3] %vm172_vm2, %v5380_v1 }
  0x2d   : > { %203 = vst.msk [vmem:[#allocation2 + $0x100] sm:$0x3] %vm172_vm2, %v5380_v1  ;;  %206 = vst.msk [vmem:[#allocation2 + $0x118] sm:$0x3] %vm172_vm2, %v5380_v1 }
  0x2e   : > { %209 = vst.msk [vmem:[#allocation2 + $0x130] sm:$0x3] %vm172_vm2, %v5380_v1  ;;  %212 = vst.msk [vmem:[#allocation2 + $0x148] sm:$0x3] %vm172_vm2, %v5380_v1 }
  0x2f   : > { %215 = vst.msk [vmem:[#allocation2 + $0x160] sm:$0x3] %vm172_vm2, %v5380_v1  ;;  %218 = vst.msk [vmem:[#allocation2 + $0x178] sm:$0x3] %vm172_vm2, %v5380_v1 }
  0x30   : > { %221 = vst.msk [vmem:[#allocation2 + $0x190] sm:$0x3] %vm172_vm2, %v5380_v1  ;;  %224 = vst.msk [vmem:[#allocation2 + $0x1a8] sm:$0x3] %vm172_vm2, %v5380_v1 }
  0x31   : > { %258 = vst.msk [vmem:[#allocation2 + $0x19] sm:$0xff] %vm169_vm1, %v225_v5  ;;  %259 = vst.msk [vmem:[#allocation2 + $0x21] sm:$0xff] %vm169_vm1, %v226_v6 }
  0x32   : > { %260 = vst.msk [vmem:[#allocation2 + $0x31] sm:$0xff] %vm169_vm1, %v227_v7  ;;  %261 = vst.msk [vmem:[#allocation2 + $0x39] sm:$0xff] %vm169_vm1, %v228_v8 }
  0x33   : > { %262 = vst.msk [vmem:[#allocation2 + $0x49] sm:$0xff] %vm169_vm1, %v229_v9  ;;  %263 = vst.msk [vmem:[#allocation2 + $0x51] sm:$0xff] %vm169_vm1, %v230_v10  ;;  %v255_v10 = vld [vmem:[%s5592_s9 + $0xf0] sm:$0xff] }
  0x34   : > { %264 = vst.msk [vmem:[#allocation2 + $0x61] sm:$0xff] %vm169_vm1, %v231_v14  ;;  %265 = vst.msk [vmem:[#allocation2 + $0x69] sm:$0xff] %vm169_vm1, %v232_v15 }
  0x35   : > { %266 = vst.msk [vmem:[#allocation2 + $0x79] sm:$0xff] %vm169_vm1, %v233_v16  ;;  %267 = vst.msk [vmem:[#allocation2 + $0x81] sm:$0xff] %vm169_vm1, %v234_v17  ;;  %v5824_v17 = vld [vmem:[%s6631_s1 + $0x1c] sm:$0x7] }
  0x36   : > { %268 = vst.msk [vmem:[#allocation2 + $0x91] sm:$0xff] %vm169_vm1, %v235_v18  ;;  %269 = vst.msk [vmem:[#allocation2 + $0x99] sm:$0xff] %vm169_vm1, %v236_v19 }
  0x37   : > { %270 = vst.msk [vmem:[#allocation2 + $0xa9] sm:$0xff] %vm169_vm1, %v237_v20  ;;  %271 = vst.msk [vmem:[#allocation2 + $0xb1] sm:$0xff] %vm169_vm1, %v238_v21 }
  0x38   : > { %272 = vst.msk [vmem:[#allocation2 + $0xc1] sm:$0xff] %vm169_vm1, %v239_v22  ;;  %273 = vst.msk [vmem:[#allocation2 + $0xc9] sm:$0xff] %vm169_vm1, %v240_v23  ;;  %v5650_v31 = vld [vmem:[#allocation2 + $0x18] sm:$0xff]  ;;  %v5654_v33 = vld [vmem:[#allocation2 + $0x20] sm:$0xff] }
  0x39   : > { %274 = vst.msk [vmem:[#allocation2 + $0xd9] sm:$0xff] %vm169_vm1, %v241_v24  ;;  %275 = vst.msk [vmem:[#allocation2 + $0xe1] sm:$0xff] %vm169_vm1, %v242_v25  ;;  %v5652_v32 = vld [vmem:[#allocation2 + $0x19] sm:$0xff]  ;;  %4571 = vmatprep.mubr.msk.f32.mxu1 %vm169_vm1, %v5650_v31  ;;  %v5663_v34 = vld [vmem:[#allocation2 + $0x21] sm:$0xff] }
  0x3a   : > { %276 = vst.msk [vmem:[#allocation2 + $0xf1] sm:$0xff] %vm169_vm1, %v243_v26  ;;  %6683 = vst [vmem:[#allocation6_spill] sm:$0xff] %v5650_v31  ;;  %4768 = vmatprep.mubr.msk.f32.mxu0 %vm169_vm1, %v5652_v32  ;;  %v5665_v35 = vld [vmem:[#allocation2 + $0x30] sm:$0xff]  ;;  %4572 = vmatmul.mubr.msk.f32.gmra.mrb[2].mxu1 %vm169_vm1, %v5654_v33  ;;  %v5677_v37 = vld [vmem:[#allocation2 + $0x38] sm:$0xff] }
  0x3b   : > { %6684 = vst [vmem:[#allocation7_spill] sm:$0xff] %v5654_v33  ;;  %277 = vst.msk [vmem:[#allocation2 + $0xf9] sm:$0xff] %vm169_vm1, %v244_v28  ;;  %v5667_v36 = vld [vmem:[#allocation2 + $0x31] sm:$0xff]  ;;  %4769 = vmatmul.mubr.msk.f32.vlgmr.msra.gmra.mrb[0].mxu0 %vm169_vm1, %v5663_v34  ;;  %4574 = vmatprep.mubr.msk.f32.mxu1 %vm169_vm1, %v5665_v35  ;;  %v5679_v38 = vld [vmem:[#allocation2 + $0x39] sm:$0xff] }
  0x3c   : > { %278 = vst.msk [vmem:[#allocation2 + $0x109] sm:$0xff] %vm169_vm1, %v245_v29  ;;  %279 = vst.msk [vmem:[#allocation2 + $0x111] sm:$0xff] %vm169_vm1, %v246_v30  ;;  %4817 = vmatpush3.msk.msra.mxu0 %vm419_vm0, %v5540_v4  ;;  %4771 = vmatprep.mubr.msk.f32.mxu0 %vm169_vm1, %v5667_v36  ;;  %v5683_v39 = vld [vmem:[#allocation2 + $0x48] sm:$0xff]  ;;  %v5697_v41 = vld [vmem:[#allocation2 + $0x50] sm:$0xff] }
  0x3d   : > { %6685 = vst [vmem:[#allocation8_spill] sm:$0xff] %v5665_v35  ;;  %6686 = vst [vmem:[#allocation9_spill] sm:$0xff] %v5683_v39  ;;  %v5685_v40 = vld [vmem:[#allocation2 + $0x49] sm:$0xff]  ;;  %4866 = vmatprep.subr.msk.mxu0 %vm419_vm0, %v5643_v27  ;;  %v5699_v42 = vld [vmem:[#allocation2 + $0x51] sm:$0xff] }
  0x3e   : > { %6687 = vst [vmem:[#allocation10_spill] sm:$0xff] %v5685_v40  ;;  %4575 = vmatmul.mubr.msk.f32.gmra.mrb[4].mxu1 %vm169_vm1, %v5677_v37  ;;  %6688 = vst [vmem:[#allocation11_spill] sm:$0xff] %v5697_v41  ;;  %v5701_v43 = vld [vmem:[#allocation2 + $0x60] sm:$0xff]  ;;  %v5713_v45 = vld [vmem:[#allocation2 + $0x68] sm:$0xff] }
  0x3f   : > { %4772 = vmatmul.mubr.msk.f32.gmra.mrb[2].mxu0 %vm169_vm1, %v5679_v38  ;;  %4577 = vmatprep.mubr.msk.f32.mxu1 %vm169_vm1, %v5683_v39  ;;  %v5703_v44 = vld [vmem:[#allocation2 + $0x61] sm:$0xff]  ;;  %6690 = vst [vmem:[#allocation13_spill] sm:$0xff] %v5713_v45  ;;  %v5715_v46 = vld [vmem:[#allocation2 + $0x69] sm:$0xff]  ;;  %v5717_v47 = vld [vmem:[#allocation2 + $0x78] sm:$0xff] }
  0x40   : > { %4774 = vmatprep.mubr.msk.f32.mxu0 %vm169_vm1, %v5685_v40  ;;  %6689 = vst [vmem:[#allocation12_spill] sm:$0xff] %v5703_v44  ;;  %v5719_v48 = vld [vmem:[#allocation2 + $0x79] sm:$0xff]  ;;  %v5732_v51 = vld [vmem:[#allocation2 + $0x81] sm:$0xff]  ;;  %v5734_v52 = vld [vmem:[#allocation2 + $0x90] sm:$0xff] }
  0x41   : > { %6691 = vst [vmem:[#allocation14_spill] sm:$0xff] %v5719_v48  ;;  %v5725_v49 = vld [vmem:[#allocation2 + $0x80] sm:$0xff]  ;;  %280 = vst.msk [vmem:[#allocation2 + $0x121] sm:$0xff] %vm169_vm1, %v247_v50  ;;  %v5738_v54 = vld [vmem:[#allocation2 + $0x91] sm:$0xff] }
  0x42   : > { %4578 = vmatmul.mubr.msk.f32.gmra.mrb[6].mxu1 %vm169_vm1, %v5697_v41  ;;  %6692 = vst [vmem:[#allocation15_spill] sm:$0xff] %v5725_v49  ;;  %6693 = vst [vmem:[#allocation16_spill] sm:$0xff] %v5738_v54  ;;  %v5757_v60 = vld [vmem:[#allocation2 + $0x98] sm:$0xff]  ;;  %v5764_v63 = vld [vmem:[#allocation2 + $0xa8] sm:$0xff] }
  0x43   : > { %4775 = vmatmul.mubr.msk.f32.gmra.mrb[4].mxu0 %vm169_vm1, %v5699_v42  ;;  %4580 = vmatprep.mubr.msk.f32.mxu1 %vm169_vm1, %v5701_v43  ;;  %281 = vst.msk [vmem:[#allocation2 + $0x129] sm:$0xff] %vm169_vm1, %v248_v53  ;;  %282 = vst.msk [vmem:[#allocation2 + $0x139] sm:$0xff] %vm169_vm1, %v249_v55  ;;  %v5759_v61 = vld [vmem:[#allocation2 + $0x99] sm:$0xff]  ;;  %v5766_v0 = vld [vmem:[#allocation2 + $0xa9] sm:$0xff] }
  0x44   : > { %4777 = vmatprep.mubr.msk.f32.mxu0 %vm169_vm1, %v5703_v44  ;;  %283 = vst.msk [vmem:[#allocation2 + $0x141] sm:$0xff] %vm169_vm1, %v250_v56  ;;  %284 = vst.msk [vmem:[#allocation2 + $0x151] sm:$0xff] %vm169_vm1, %v251_v57  ;;  %v5777_v1 = vld [vmem:[#allocation2 + $0xb0] sm:$0xff]  ;;  %v5781_v4 = vld [vmem:[#allocation2 + $0xc0] sm:$0xff] }
  0x45   : > { %6694 = vst [vmem:[#allocation17_spill] sm:$0xff] %v5757_v60  ;;  %285 = vst.msk [vmem:[#allocation2 + $0x159] sm:$0xff] %vm169_vm1, %v252_v58  ;;  %v5779_v3 = vld [vmem:[#allocation2 + $0xb1] sm:$0xff]  ;;  %v5783_v5 = vld [vmem:[#allocation2 + $0xc1] sm:$0xff] }
  0x46   : > { %4581 = vmatmul.mubr.msk.f32.gmra.mrb[8].mxu1 %vm169_vm1, %v5713_v45  ;;  %286 = vst.msk [vmem:[#allocation2 + $0x169] sm:$0xff] %vm169_vm1, %v253_v59  ;;  %6695 = vst [vmem:[#allocation18_spill] sm:$0xff] %v5766_v0  ;;  %v5793_v6 = vld [vmem:[#allocation2 + $0xc8] sm:$0xff]  ;;  %v5797_v8 = vld [vmem:[#allocation2 + $0xd8] sm:$0xff] }
  0x47   : > { %4778 = vmatmul.mubr.msk.f32.gmra.mrb[6].mxu0 %vm169_vm1, %v5715_v46  ;;  %4583 = vmatprep.mubr.msk.f32.mxu1 %vm169_vm1, %v5717_v47  ;;  %287 = vst.msk [vmem:[#allocation2 + $0x171] sm:$0xff] %vm169_vm1, %v254_v62  ;;  %6696 = vst [vmem:[#allocation19_spill] sm:$0xff] %v5777_v1  ;;  %v5795_v7 = vld [vmem:[#allocation2 + $0xc9] sm:$0xff]  ;;  %v5799_v9 = vld [vmem:[#allocation2 + $0x1a] sm:$0xff] }
  0x48   : > { %4780 = vmatprep.mubr.msk.f32.mxu0 %vm169_vm1, %v5719_v48  ;;  %6697 = vst [vmem:[#allocation20_spill] sm:$0xff] %v5783_v5  ;;  %288 = vst.msk [vmem:[#allocation2 + $0x181] sm:$0xff] %vm169_vm1, %v255_v10  ;;  %v5813_v13 = vld [vmem:[#allocation2 + $0xe0] sm:$0xff]  ;;  %v5817_v15 = vld [vmem:[#allocation2 + $0xf0] sm:$0xff] }
  0x49   : > { %289 = vst.msk [vmem:[#allocation2 + $0x189] sm:$0xff] %vm169_vm1, %v256_v12  ;;  %v5815_v14 = vld [vmem:[#allocation2 + $0x22] sm:$0xff]  ;;  %v5819_v16 = vld [vmem:[#allocation2 + $0x32] sm:$0xff]  ;;  %v5836_v19 = vld [vmem:[#allocation2 + $0x3a] sm:$0xff] }
  0x4a   : > { %4584 = vmatmul.mubr.msk.f32.gmra.mrb[10].mxu1 %vm169_vm1, %v5725_v49  ;;  %v5834_v18 = vld [vmem:[#allocation2 + $0xf8] sm:$0xff]  ;;  %v5840_v20 = vld [vmem:[#allocation2 + $0x108] sm:$0xff]  ;;  %v5854_v22 = vld [vmem:[#allocation2 + $0x110] sm:$0xff] }
  0x4b   : > { %4781 = vmatmul.mubr.msk.f32.gmra.mrb[8].mxu0 %vm169_vm1, %v5732_v51  ;;  %4586 = vmatprep.mubr.msk.f32.mxu1 %vm169_vm1, %v5734_v52  ;;  %v5842_v21 = vld [vmem:[#allocation2 + $0x4a] sm:$0xff]  ;;  %v5856_v23 = vld [vmem:[#allocation2 + $0x52] sm:$0xff]  ;;  %v5858_v24 = vld [vmem:[#allocation2 + $0x120] sm:$0xff] }
  0x4c   : > { %4783 = vmatprep.mubr.msk.f32.mxu0 %vm169_vm1, %v5738_v54  ;;  %v5860_v25 = vld [vmem:[#allocation2 + $0x62] sm:$0xff]  ;;  %v5874_v28 = vld [vmem:[#allocation2 + $0x138] sm:$0xff]  ;;  %v5890_v53 = vld [vmem:[#allocation2 + $0x150] sm:$0xff] }
  0x4d   : > { %v5870_v26 = vld [vmem:[#allocation2 + $0x128] sm:$0xff]  ;;  %v5876_v29 = vld [vmem:[#allocation2 + $0x7a] sm:$0xff]  ;;  %v5892_v55 = vld [vmem:[#allocation2 + $0x92] sm:$0xff] }
  0x4e   : > { %4587 = vmatmul.mubr.msk.f32.gmra.mrb[12].mxu1 %vm169_vm1, %v5757_v60  ;;  %v5886_v30 = vld [vmem:[#allocation2 + $0x140] sm:$0xff]  ;;  %v5902_v56 = vld [vmem:[#allocation2 + $0x158] sm:$0xff]  ;;  %v5906_v58 = vld [vmem:[#allocation2 + $0x168] sm:$0xff] }
  0x4f   : > { %4784 = vmatmul.mubr.msk.f32.gmra.mrb[10].mxu0 %vm169_vm1, %v5759_v61  ;;  %4589 = vmatprep.mubr.msk.f32.mxu1 %vm169_vm1, %v5764_v63  ;;  %v5888_v50 = vld [vmem:[#allocation2 + $0x82] sm:$0xff]  ;;  %6698 = vst [vmem:[#allocation21_spill] sm:$0xff] %v5902_v56  ;;  %v5904_v57 = vld [vmem:[#allocation2 + $0x9a] sm:$0xff]  ;;  %v5908_v59 = vld [vmem:[#allocation2 + $0xaa] sm:$0xff] }
  0x50   : > { %4786 = vmatprep.mubr.msk.f32.mxu0 %vm169_vm1, %v5766_v0  ;;  %6699 = vst [vmem:[#allocation22_spill] sm:$0xff] %v5904_v57  ;;  %6700 = vst [vmem:[#allocation23_spill] sm:$0xff] %v5908_v59  ;;  %v5918_v62 = vld [vmem:[#allocation2 + $0x170] sm:$0xff]  ;;  %v680_v12 = vld [vmem:[#allocation2 + $0x1] sm:$0xff] }
  0x51   : > { %6701 = vst [vmem:[#allocation24_spill] sm:$0xff] %v5918_v62  ;;  %v5920_v10 = vld [vmem:[#allocation2 + $0xb2] sm:$0xff]  ;;  %v5922_v33 = vld [vmem:[#allocation2 + $0xc2] sm:$0xff] }
  0x52   : > { %4590 = vmatmul.mubr.msk.f32.gmra.mrb[14].mxu1 %vm169_vm1, %v5777_v1  ;;  %v681_v31 = vld [vmem:[#allocation2 + $0x9] sm:$0xff] }
  0x53   : > { %4787 = vmatmul.mubr.msk.f32.gmra.mrb[12].mxu0 %vm169_vm1, %v5779_v3  ;;  %4592 = vmatprep.mubr.msk.f32.mxu1 %vm169_vm1, %v5781_v4 }
  0x54   : > { %4789 = vmatprep.mubr.msk.f32.mxu0 %vm169_vm1, %v5783_v5 }
  0x56   : > { %4593 = vmatmul.mubr.msk.f32.gmra.mrb[16].mxu1 %vm169_vm1, %v5793_v6 }
  0x57   : > { %4790 = vmatmul.mubr.msk.f32.gmra.mrb[14].mxu0 %vm169_vm1, %v5795_v7  ;;  %4595 = vmatprep.mubr.msk.f32.mxu1 %vm169_vm1, %v5797_v8 }
  0x58   : > { %4818 = vmatprep.mubr.msk.f32.mxu0 %vm169_vm1, %v5799_v9 }
  0x5a   : > { %4596 = vmatmul.mubr.msk.f32.gmra.mrb[18].mxu1 %vm169_vm1, %v5813_v13 }
  0x5b   : > { %4819 = vmatmul.mubr.msk.f32.vlgmr.msra.gmra.mrb[0].mxu0 %vm169_vm1, %v5815_v14  ;;  %4598 = vmatprep.mubr.msk.f32.mxu1 %vm169_vm1, %v5817_v15 }
  0x5c   : > { %4867 = vmatpush3.msk.msra.mxu0 %vm419_vm0, %v5643_v27  ;;  %4821 = vmatprep.mubr.msk.f32.mxu0 %vm169_vm1, %v5819_v16  ;;  %v5872_v27 = vld [vmem:[#allocation2 + $0x6a] sm:$0xff] }
  0x5d   : > { %4916 = vmatprep.subr.msk.mxu0 %vm419_vm0, %v5824_v17 }
  0x5e   : > { %4599 = vmatmul.mubr.msk.f32.gmra.mrb[20].mxu1 %vm169_vm1, %v5834_v18 }
  0x5f   : > { %4822 = vmatmul.mubr.msk.f32.gmra.mrb[2].mxu0 %vm169_vm1, %v5836_v19  ;;  %4601 = vmatprep.mubr.msk.f32.mxu1 %vm169_vm1, %v5840_v20 }
  0x60   : > { %4824 = vmatprep.mubr.msk.f32.mxu0 %vm169_vm1, %v5842_v21 }
  0x62   : > { %4602 = vmatmul.mubr.msk.f32.gmra.mrb[22].mxu1 %vm169_vm1, %v5854_v22 }
  0x63   : > { %4825 = vmatmul.mubr.msk.f32.gmra.mrb[4].mxu0 %vm169_vm1, %v5856_v23  ;;  %4604 = vmatprep.mubr.msk.f32.mxu1 %vm169_vm1, %v5858_v24 }
  0x64   : > { %4827 = vmatprep.mubr.msk.f32.mxu0 %vm169_vm1, %v5860_v25 }
  0x66   : > { %4605 = vmatmul.mubr.msk.f32.gmra.mrb[24].mxu1 %vm169_vm1, %v5870_v26 }
  0x67   : > { %4828 = vmatmul.mubr.msk.f32.gmra.mrb[6].mxu0 %vm169_vm1, %v5872_v27  ;;  %4607 = vmatprep.mubr.msk.f32.mxu1 %vm169_vm1, %v5874_v28 }
  0x68   : > { %4830 = vmatprep.mubr.msk.f32.mxu0 %vm169_vm1, %v5876_v29 }
  0x6a   : > { %4608 = vmatmul.mubr.msk.f32.gmra.mrb[26].mxu1 %vm169_vm1, %v5886_v30 }
  0x6b   : > { %4831 = vmatmul.mubr.msk.f32.gmra.mrb[8].mxu0 %vm169_vm1, %v5888_v50  ;;  %4610 = vmatprep.mubr.msk.f32.mxu1 %vm169_vm1, %v5890_v53 }
  0x6c   : > { %4833 = vmatprep.mubr.msk.f32.mxu0 %vm169_vm1, %v5892_v55 }
  0x6e   : > { %4611 = vmatmul.mubr.msk.f32.gmra.mrb[28].mxu1 %vm169_vm1, %v5902_v56 }
  0x6f   : > { %4834 = vmatmul.mubr.msk.f32.gmra.mrb[10].mxu0 %vm169_vm1, %v5904_v57  ;;  %4613 = vmatprep.mubr.msk.f32.mxu1 %vm169_vm1, %v5906_v58  ;;  %v5933_v57 = vld [vmem:[#allocation2 + $0xda] sm:$0xff] }
  0x70   : > { %4836 = vmatprep.mubr.msk.f32.mxu0 %vm169_vm1, %v5908_v59  ;;  %v5931_v59 = vld [vmem:[#allocation2 + $0xca] sm:$0xff] }
  0x72   : > { %4614 = vmatmul.mubr.msk.f32.gmra.mrb[30].mxu1 %vm169_vm1, %v5918_v62  ;;  %v5941_v62 = vld [vmem:[%s6631_s1 + $0xc] sm:$0x7] }
  0x73   : > { %4837 = vmatmul.mubr.msk.f32.gmra.mrb[12].mxu0 %vm169_vm1, %v5920_v10  ;;  %4618 = vmatprep.mubr.msk.f32.mxu1 %vm169_vm1, %v680_v12  ;;  %v5947_v12 = vld [vmem:[#allocation2 + $0xe2] sm:$0xff] }
  0x74   : > { %4839 = vmatprep.mubr.msk.f32.mxu0 %vm169_vm1, %v5922_v33  ;;  %6702 = vst [vmem:[#allocation25_spill] sm:$0xff] %v5947_v12 }
  0x76   : > { %4619 = vmatmul.mubr.msk.f32.vlgmr.msra.gmra.mrb[0].mxu1 %vm169_vm1, %v681_v31  ;;  %v5951_v31 = vld [vmem:[#allocation2 + $0xf2] sm:$0xff] }
  0x77   : > { %4840 = vmatmul.mubr.msk.f32.gmra.mrb[14].mxu0 %vm169_vm1, %v5931_v59  ;;  %4621 = vmatprep.mubr.msk.f32.mxu1 %vm169_vm1, %v5652_v32  ;;  %v5963_v32 = vld [vmem:[#allocation2 + $0xfa] sm:$0xff] }
  0x78   : > { %4842 = vmatprep.mubr.msk.f32.mxu0 %vm169_vm1, %v5933_v57  ;;  %4667 = vmatpush3.msk.msra.mxu1 %vm419_vm0, %v5606_v11  ;;  %6703 = vst [vmem:[#allocation26_spill] sm:$0xff] %v5963_v32  ;;  %v5965_v11 = vld [vmem:[#allocation2 + $0x10a] sm:$0xff] }
  0x79   : > { %4716 = vmatprep.subr.msk.mxu1 %vm419_vm0, %v5941_v62 }
  0x7a   : > { %4622 = vmatmul.mubr.msk.f32.gmra.mrb[2].mxu1 %vm169_vm1, %v5663_v34  ;;  %v5975_v34 = vld [vmem:[#allocation2 + $0x112] sm:$0xff] }
  0x7b   : > { %4843 = vmatmul.mubr.msk.f32.gmra.mrb[16].mxu0 %vm169_vm1, %v5947_v12  ;;  %4624 = vmatprep.mubr.msk.f32.mxu1 %vm169_vm1, %v5667_v36  ;;  %6704 = vst [vmem:[#allocation27_spill] sm:$0xff] %v5975_v34  ;;  %v5977_v12 = vld [vmem:[#allocation2 + $0x122] sm:$0xff] }
  0x7c   : > { %4845 = vmatprep.mubr.msk.f32.mxu0 %vm169_vm1, %v5951_v31 }
  0x7e   : > { %4625 = vmatmul.mubr.msk.f32.gmra.mrb[4].mxu1 %vm169_vm1, %v5679_v38 }
  0x7f   : > { %4846 = vmatmul.mubr.msk.f32.gmra.mrb[18].mxu0 %vm169_vm1, %v5963_v32  ;;  %4627 = vmatprep.mubr.msk.f32.mxu1 %vm169_vm1, %v5685_v40  ;;  %v5987_v32 = vld [vmem:[#allocation2 + $0x12a] sm:$0xff]  ;;  %v5989_v40 = vld [vmem:[#allocation2 + $0x13a] sm:$0xff] }
  0x80   : > { %4848 = vmatprep.mubr.msk.f32.mxu0 %vm169_vm1, %v5965_v11  ;;  %6705 = vst [vmem:[#allocation28_spill] sm:$0xff] %v5987_v32 }
  0x82   : > { %4628 = vmatmul.mubr.msk.f32.gmra.mrb[6].mxu1 %vm169_vm1, %v5699_v42 }
  0x83   : > { %4849 = vmatmul.mubr.msk.f32.gmra.mrb[20].mxu0 %vm169_vm1, %v5975_v34  ;;  %4630 = vmatprep.mubr.msk.f32.mxu1 %vm169_vm1, %v5703_v44  ;;  %v5999_v34 = vld [vmem:[#allocation2 + $0x142] sm:$0xff]  ;;  %v6001_v44 = vld [vmem:[#allocation2 + $0x152] sm:$0xff] }
  0x84   : > { %4851 = vmatprep.mubr.msk.f32.mxu0 %vm169_vm1, %v5977_v12  ;;  %6706 = vst [vmem:[#allocation29_spill] sm:$0xff] %v5999_v34 }
  0x86   : > { %4631 = vmatmul.mubr.msk.f32.gmra.mrb[8].mxu1 %vm169_vm1, %v5715_v46 }
  0x87   : > { %4852 = vmatmul.mubr.msk.f32.gmra.mrb[22].mxu0 %vm169_vm1, %v5987_v32  ;;  %4633 = vmatprep.mubr.msk.f32.mxu1 %vm169_vm1, %v5719_v48  ;;  %v6011_v32 = vld [vmem:[#allocation2 + $0x15a] sm:$0xff]  ;;  %v6013_v48 = vld [vmem:[#allocation2 + $0x16a] sm:$0xff] }
  0x88   : > { %4854 = vmatprep.mubr.msk.f32.mxu0 %vm169_vm1, %v5989_v40  ;;  %6707 = vst [vmem:[#allocation30_spill] sm:$0xff] %v6011_v32 }
  0x8a   : > { %4634 = vmatmul.mubr.msk.f32.gmra.mrb[10].mxu1 %vm169_vm1, %v5732_v51 }
  0x8b   : > { %4855 = vmatmul.mubr.msk.f32.gmra.mrb[24].mxu0 %vm169_vm1, %v5999_v34  ;;  %4636 = vmatprep.mubr.msk.f32.mxu1 %vm169_vm1, %v5738_v54  ;;  %v6023_v34 = vld [vmem:[#allocation2 + $0x172] sm:$0xff]  ;;  %v6025_v54 = vld [vmem:[#allocation2 + $0x182] sm:$0xff] }
  0x8c   : > { %4857 = vmatprep.mubr.msk.f32.mxu0 %vm169_vm1, %v6001_v44  ;;  %6708 = vst [vmem:[#allocation31_spill] sm:$0xff] %v6023_v34  ;;  %6709 = vst [vmem:[#allocation32_spill] sm:$0xff] %v6025_v54 }
  0x8e   : > { %4637 = vmatmul.mubr.msk.f32.gmra.mrb[12].mxu1 %vm169_vm1, %v5759_v61 }
  0x8f   : > { %4858 = vmatmul.mubr.msk.f32.gmra.mrb[26].mxu0 %vm169_vm1, %v6011_v32  ;;  %4639 = vmatprep.mubr.msk.f32.mxu1 %vm169_vm1, %v5766_v0  ;;  %v6035_v32 = vld [vmem:[#allocation2 + $0x18a] sm:$0xff]  ;;  %v6037_v0 = vld [vmem:[#allocation2 + $0xd9] sm:$0xff] }
  0x90   : > { %4860 = vmatprep.mubr.msk.f32.mxu0 %vm169_vm1, %v6013_v48  ;;  %6710 = vst [vmem:[#allocation33_spill] sm:$0xff] %v6035_v32 }
  0x92   : > { %4640 = vmatmul.mubr.msk.f32.gmra.mrb[14].mxu1 %vm169_vm1, %v5779_v3 }
  0x93   : > { %4861 = vmatmul.mubr.msk.f32.gmra.mrb[28].mxu0 %vm169_vm1, %v6023_v34  ;;  %4642 = vmatprep.mubr.msk.f32.mxu1 %vm169_vm1, %v5783_v5  ;;  %v6047_v34 = vld [vmem:[#allocation2 + $0xe1] sm:$0xff]  ;;  %v6049_v5 = vld [vmem:[#allocation2 + $0xf1] sm:$0xff] }
  0x94   : > { %4863 = vmatprep.mubr.msk.f32.mxu0 %vm169_vm1, %v6025_v54  ;;  %v6054_v54 = vld [vmem:[%s6631_s1 + $0x20] sm:$0x7] }
  0x96   : > { %4643 = vmatmul.mubr.msk.f32.gmra.mrb[16].mxu1 %vm169_vm1, %v5795_v7 }
  0x97   : > { %4864 = vmatmul.mubr.msk.f32.gmra.mrb[30].mxu0 %vm169_vm1, %v6035_v32  ;;  %4645 = vmatprep.mubr.msk.f32.mxu1 %vm169_vm1, %v6037_v0  ;;  %v6064_v32 = vld [vmem:[#allocation2 + $0xf9] sm:$0xff] }
  0x98   : > { %4868 = vmatprep.mubr.msk.f32.mxu0 %vm169_vm1, %v5665_v35  ;;  %v6068_v35 = vld [vmem:[#allocation2 + $0x109] sm:$0xff] }
  0x99   : > { %6711 = vst [vmem:[#allocation34_spill] sm:$0xff] %v6068_v35 }
  0x9a   : > { %4646 = vmatmul.mubr.msk.f32.gmra.mrb[18].mxu1 %vm169_vm1, %v6047_v34 }
  0x9b   : > { %4869 = vmatmul.mubr.msk.f32.vlgmr.msra.gmra.mrb[0].mxu0 %vm169_vm1, %v5677_v37  ;;  %4648 = vmatprep.mubr.msk.f32.mxu1 %vm169_vm1, %v6049_v5 }
  0x9c   : > { %4917 = vmatpush3.msk.msra.mxu0 %vm419_vm0, %v5824_v17  ;;  %4871 = vmatprep.mubr.msk.f32.mxu0 %vm169_vm1, %v5683_v39  ;;  %v6080_v17 = vld [vmem:[#allocation2 + $0x111] sm:$0xff]  ;;  %v6082_v39 = vld [vmem:[#allocation2 + $0x121] sm:$0xff] }
  0x9d   : > { %4966 = vmatprep.subr.msk.mxu0 %vm419_vm0, %v6054_v54  ;;  %6712 = vst [vmem:[#allocation35_spill] sm:$0xff] %v6082_v39 }
  0x9e   : > { %4649 = vmatmul.mubr.msk.f32.gmra.mrb[20].mxu1 %vm169_vm1, %v6064_v32 }
  0x9f   : > { %4872 = vmatmul.mubr.msk.f32.gmra.mrb[2].mxu0 %vm169_vm1, %v5697_v41  ;;  %4651 = vmatprep.mubr.msk.f32.mxu1 %vm169_vm1, %v6068_v35  ;;  %v6092_v41 = vld [vmem:[#allocation2 + $0x129] sm:$0xff]  ;;  %v6094_v35 = vld [vmem:[#allocation2 + $0x139] sm:$0xff] }
  0xa0   : > { %4874 = vmatprep.mubr.msk.f32.mxu0 %vm169_vm1, %v5701_v43  ;;  %6713 = vst [vmem:[#allocation36_spill] sm:$0xff] %v6094_v35 }
  0xa2   : > { %4652 = vmatmul.mubr.msk.f32.gmra.mrb[22].mxu1 %vm169_vm1, %v6080_v17 }
  0xa3   : > { %4875 = vmatmul.mubr.msk.f32.gmra.mrb[4].mxu0 %vm169_vm1, %v5713_v45  ;;  %4654 = vmatprep.mubr.msk.f32.mxu1 %vm169_vm1, %v6082_v39  ;;  %v6104_v45 = vld [vmem:[#allocation2 + $0x141] sm:$0xff]  ;;  %v6106_v39 = vld [vmem:[#allocation2 + $0x151] sm:$0xff] }
  0xa4   : > { %4877 = vmatprep.mubr.msk.f32.mxu0 %vm169_vm1, %v5717_v47  ;;  %6714 = vst [vmem:[#allocation37_spill] sm:$0xff] %v6106_v39 }
  0xa6   : > { %4655 = vmatmul.mubr.msk.f32.gmra.mrb[24].mxu1 %vm169_vm1, %v6092_v41 }
  0xa7   : > { %4878 = vmatmul.mubr.msk.f32.gmra.mrb[6].mxu0 %vm169_vm1, %v5725_v49  ;;  %4657 = vmatprep.mubr.msk.f32.mxu1 %vm169_vm1, %v6094_v35  ;;  %v6116_v49 = vld [vmem:[#allocation2 + $0x159] sm:$0xff]  ;;  %v6118_v35 = vld [vmem:[#allocation2 + $0x169] sm:$0xff] }
  0xa8   : > { %4880 = vmatprep.mubr.msk.f32.mxu0 %vm169_vm1, %v5734_v52 }
  0xaa   : > { %4658 = vmatmul.mubr.msk.f32.gmra.mrb[26].mxu1 %vm169_vm1, %v6104_v45 }
  0xab   : > { %4881 = vmatmul.mubr.msk.f32.gmra.mrb[8].mxu0 %vm169_vm1, %v5757_v60  ;;  %4660 = vmatprep.mubr.msk.f32.mxu1 %vm169_vm1, %v6106_v39  ;;  %v6128_v60 = vld [vmem:[#allocation2 + $0x171] sm:$0xff]  ;;  %v1070_v39 = vld [vmem:[#allocation2 + $0x2] sm:$0xff] }
  0xac   : > { %4883 = vmatprep.mubr.msk.f32.mxu0 %vm169_vm1, %v5764_v63 }
  0xae   : > { %4661 = vmatmul.mubr.msk.f32.gmra.mrb[28].mxu1 %vm169_vm1, %v6116_v49 }
  0xaf   : > { %4884 = vmatmul.mubr.msk.f32.gmra.mrb[10].mxu0 %vm169_vm1, %v5777_v1  ;;  %4663 = vmatprep.mubr.msk.f32.mxu1 %vm169_vm1, %v6118_v35  ;;  %v1071_v1 = vld [vmem:[#allocation2 + $0xa] sm:$0xff] }
  0xb0   : > { %4886 = vmatprep.mubr.msk.f32.mxu0 %vm169_vm1, %v5781_v4 }
  0xb2   : > { %4664 = vmatmul.mubr.msk.f32.gmra.mrb[30].mxu1 %vm169_vm1, %v6128_v60 }
  0xb3   : > { %4887 = vmatmul.mubr.msk.f32.gmra.mrb[12].mxu0 %vm169_vm1, %v5793_v6  ;;  %4668 = vmatprep.mubr.msk.f32.mxu1 %vm169_vm1, %v1070_v39  ;;  %v6188_v39 = vld [vmem:[#allocation2 + $0x180] sm:$0xff] }
  0xb4   : > { %4889 = vmatprep.mubr.msk.f32.mxu0 %vm169_vm1, %v5797_v8  ;;  %6715 = vst [vmem:[#allocation38_spill] sm:$0xff] %v6188_v39 }
  0xb6   : > { %4669 = vmatmul.mubr.msk.f32.vlgmr.msra.gmra.mrb[0].mxu1 %vm169_vm1, %v1071_v1  ;;  %v6716_v1 = vld [vmem:[#allocation22_spill] sm:$0xff] }
  0xb7   : > { %4890 = vmatmul.mubr.msk.f32.gmra.mrb[14].mxu0 %vm169_vm1, %v5813_v13  ;;  %4671 = vmatprep.mubr.msk.f32.mxu1 %vm169_vm1, %v5799_v9  ;;  %v6717_v9 = vld [vmem:[#allocation24_spill] sm:$0xff] }
  0xb8   : > { %4892 = vmatprep.mubr.msk.f32.mxu0 %vm169_vm1, %v5817_v15  ;;  %4717 = vmatpush3.msk.msra.mxu1 %vm419_vm0, %v5941_v62  ;;  %v6198_v62 = vld [vmem:[#allocation2 + $0x188] sm:$0xff] }
  0xb9   : > { %5016 = vmatprep.subr.msk.mxu1 %vm419_vm0, %v5532_v2 }
  0xba   : > { %4672 = vmatmul.mubr.msk.f32.gmra.mrb[2].mxu1 %vm169_vm1, %v5815_v14  ;;  %v6718_v14 = vld [vmem:[#allocation23_spill] sm:$0xff] }
  0xbb   : > { %4893 = vmatmul.mubr.msk.f32.gmra.mrb[16].mxu0 %vm169_vm1, %v5834_v18  ;;  %4674 = vmatprep.mubr.msk.f32.mxu1 %vm169_vm1, %v5819_v16 }
  0xbc   : > { %4895 = vmatprep.mubr.msk.f32.mxu0 %vm169_vm1, %v5840_v20 }
  0xbe   : > { %4675 = vmatmul.mubr.msk.f32.gmra.mrb[4].mxu1 %vm169_vm1, %v5836_v19 }
  0xbf   : > { %4896 = vmatmul.mubr.msk.f32.gmra.mrb[18].mxu0 %vm169_vm1, %v5854_v22  ;;  %4677 = vmatprep.mubr.msk.f32.mxu1 %vm169_vm1, %v5842_v21 }
  0xc0   : > { %4898 = vmatprep.mubr.msk.f32.mxu0 %vm169_vm1, %v5858_v24 }
  0xc2   : > { %4678 = vmatmul.mubr.msk.f32.gmra.mrb[6].mxu1 %vm169_vm1, %v5856_v23 }
  0xc3   : > { %4899 = vmatmul.mubr.msk.f32.gmra.mrb[20].mxu0 %vm169_vm1, %v5870_v26  ;;  %4680 = vmatprep.mubr.msk.f32.mxu1 %vm169_vm1, %v5860_v25 }
  0xc4   : > { %4901 = vmatprep.mubr.msk.f32.mxu0 %vm169_vm1, %v5874_v28 }
  0xc6   : > { %4681 = vmatmul.mubr.msk.f32.gmra.mrb[8].mxu1 %vm169_vm1, %v5872_v27 }
  0xc7   : > { %4902 = vmatmul.mubr.msk.f32.gmra.mrb[22].mxu0 %vm169_vm1, %v5886_v30  ;;  %4683 = vmatprep.mubr.msk.f32.mxu1 %vm169_vm1, %v5876_v29 }
  0xc8   : > { %4904 = vmatprep.mubr.msk.f32.mxu0 %vm169_vm1, %v5890_v53 }
  0xca   : > { %4684 = vmatmul.mubr.msk.f32.gmra.mrb[10].mxu1 %vm169_vm1, %v5888_v50 }
  0xcb   : > { %4905 = vmatmul.mubr.msk.f32.gmra.mrb[24].mxu0 %vm169_vm1, %v5902_v56  ;;  %4686 = vmatprep.mubr.msk.f32.mxu1 %vm169_vm1, %v5892_v55  ;;  %v2661_v56 = vld [vmem:[#allocation2 + $0x198] sm:$0xff] }
  0xcc   : > { %4907 = vmatprep.mubr.msk.f32.mxu0 %vm169_vm1, %v5906_v58 }
  0xce   : > { %4687 = vmatmul.mubr.msk.f32.gmra.mrb[12].mxu1 %vm169_vm1, %v6716_v1 }
  0xcf   : > { %4908 = vmatmul.mubr.msk.f32.gmra.mrb[26].mxu0 %vm169_vm1, %v6717_v9  ;;  %4689 = vmatprep.mubr.msk.f32.mxu1 %vm169_vm1, %v6718_v14  ;;  %v2662_v9 = vld [vmem:[#allocation2 + $0x1a0] sm:$0xff] }
  0xd0   : > { %4910 = vmatprep.mubr.msk.f32.mxu0 %vm169_vm1, %v6188_v39  ;;  %v6719_v39 = vld [vmem:[#allocation25_spill] sm:$0xff] }
  0xd2   : > { %4690 = vmatmul.mubr.msk.f32.gmra.mrb[14].mxu1 %vm169_vm1, %v5920_v10 }
  0xd3   : > { %4911 = vmatmul.mubr.msk.f32.gmra.mrb[28].mxu0 %vm169_vm1, %v6198_v62  ;;  %4692 = vmatprep.mubr.msk.f32.mxu1 %vm169_vm1, %v5922_v33 }
  0xd4   : > { %4913 = vmatprep.mubr.msk.f32.mxu0 %vm169_vm1, %v2661_v56  ;;  %v6720_v56 = vld [vmem:[#allocation10_spill] sm:$0xff] }
  0xd6   : > { %4693 = vmatmul.mubr.msk.f32.gmra.mrb[16].mxu1 %vm169_vm1, %v5931_v59 }
  0xd7   : > { %4914 = vmatmul.mubr.msk.f32.gmra.mrb[30].mxu0 %vm169_vm1, %v2662_v9  ;;  %4695 = vmatprep.mubr.msk.f32.mxu1 %vm169_vm1, %v5933_v57  ;;  %v6721_v9 = vld [vmem:[#allocation26_spill] sm:$0xff] }
  0xd8   : > { %4918 = vmatprep.mubr.msk.f32.mxu0 %vm169_vm1, %v5667_v36  ;;  %v6722_v36 = vld [vmem:[#allocation12_spill] sm:$0xff] }
  0xda   : > { %4696 = vmatmul.mubr.msk.f32.gmra.mrb[18].mxu1 %vm169_vm1, %v6719_v39 }
  0xdb   : > { %4919 = vmatmul.mubr.msk.f32.vlgmr.msra.gmra.mrb[0].mxu0 %vm169_vm1, %v5679_v38  ;;  %4698 = vmatprep.mubr.msk.f32.mxu1 %vm169_vm1, %v5951_v31  ;;  %v6723_v38 = vld [vmem:[#allocation27_spill] sm:$0xff] }
  0xdc   : > { %4967 = vmatpush3.msk.msra.mxu0 %vm419_vm0, %v6054_v54  ;;  %4921 = vmatprep.mubr.msk.f32.mxu0 %vm169_vm1, %v6720_v56  ;;  %v6724_v54 = vld [vmem:[#allocation14_spill] sm:$0xff]  ;;  %v6725_v56 = vld [vmem:[#allocation28_spill] sm:$0xff] }
  0xde   : > { %4699 = vmatmul.mubr.msk.f32.gmra.mrb[20].mxu1 %vm169_vm1, %v6721_v9 }
  0xdf   : > { %4922 = vmatmul.mubr.msk.f32.gmra.mrb[2].mxu0 %vm169_vm1, %v5699_v42  ;;  %4701 = vmatprep.mubr.msk.f32.mxu1 %vm169_vm1, %v5965_v11  ;;  %v6726_v42 = vld [vmem:[#allocation16_spill] sm:$0xff] }
  0xe0   : > { %4924 = vmatprep.mubr.msk.f32.mxu0 %vm169_vm1, %v6722_v36  ;;  %v6727_v36 = vld [vmem:[#allocation29_spill] sm:$0xff] }
  0xe2   : > { %4702 = vmatmul.mubr.msk.f32.gmra.mrb[22].mxu1 %vm169_vm1, %v6723_v38 }
  0xe3   : > { %4925 = vmatmul.mubr.msk.f32.gmra.mrb[4].mxu0 %vm169_vm1, %v5715_v46  ;;  %4704 = vmatprep.mubr.msk.f32.mxu1 %vm169_vm1, %v5977_v12  ;;  %v6728_v46 = vld [vmem:[#allocation18_spill] sm:$0xff] }
  0xe4   : > { %4927 = vmatprep.mubr.msk.f32.mxu0 %vm169_vm1, %v6724_v54  ;;  %v6729_v54 = vld [vmem:[#allocation30_spill] sm:$0xff] }
  0xe6   : > { %4705 = vmatmul.mubr.msk.f32.gmra.mrb[24].mxu1 %vm169_vm1, %v6725_v56 }
  0xe7   : > { %4928 = vmatmul.mubr.msk.f32.gmra.mrb[6].mxu0 %vm169_vm1, %v5732_v51  ;;  %4707 = vmatprep.mubr.msk.f32.mxu1 %vm169_vm1, %v5989_v40  ;;  %v6730_v51 = vld [vmem:[#allocation20_spill] sm:$0xff] }
  0xe8   : > { %4930 = vmatprep.mubr.msk.f32.mxu0 %vm169_vm1, %v6726_v42  ;;  %v6731_v42 = vld [vmem:[#allocation31_spill] sm:$0xff] }
  0xea   : > { %4708 = vmatmul.mubr.msk.f32.gmra.mrb[26].mxu1 %vm169_vm1, %v6727_v36 }
  0xeb   : > { %4931 = vmatmul.mubr.msk.f32.gmra.mrb[8].mxu0 %vm169_vm1, %v5759_v61  ;;  %4710 = vmatprep.mubr.msk.f32.mxu1 %vm169_vm1, %v6001_v44  ;;  %v6732_v61 = vld [vmem:[#allocation6_spill] sm:$0xff] }
  0xec   : > { %4933 = vmatprep.mubr.msk.f32.mxu0 %vm169_vm1, %v6728_v46  ;;  %v6733_v46 = vld [vmem:[#allocation7_spill] sm:$0xff] }
  0xee   : > { %4711 = vmatmul.mubr.msk.f32.gmra.mrb[28].mxu1 %vm169_vm1, %v6729_v54 }
  0xef   : > { %4934 = vmatmul.mubr.msk.f32.gmra.mrb[10].mxu0 %vm169_vm1, %v5779_v3  ;;  %4713 = vmatprep.mubr.msk.f32.mxu1 %vm169_vm1, %v6013_v48  ;;  %v6734_v3 = vld [vmem:[#allocation8_spill] sm:$0xff] }
  0xf0   : > { %4936 = vmatprep.mubr.msk.f32.mxu0 %vm169_vm1, %v6730_v51  ;;  %v6736_v51 = vld [vmem:[#allocation34_spill] sm:$0xff] }
  0xf2   : > { %4714 = vmatmul.mubr.msk.f32.gmra.mrb[30].mxu1 %vm169_vm1, %v6731_v42 }
  0xf3   : > { %4937 = vmatmul.mubr.msk.f32.gmra.mrb[12].mxu0 %vm169_vm1, %v5795_v7  ;;  %4718 = vmatprep.mubr.msk.f32.mxu1 %vm169_vm1, %v6732_v61  ;;  %v6735_v7 = vld [vmem:[#allocation9_spill] sm:$0xff]  ;;  %v6737_v61 = vld [vmem:[#allocation11_spill] sm:$0xff] }
  0xf4   : > { %4939 = vmatprep.mubr.msk.f32.mxu0 %vm169_vm1, %v6037_v0 }
  0xf6   : > { %4719 = vmatmul.mubr.msk.f32.vlgmr.msra.gmra.mrb[0].mxu1 %vm169_vm1, %v6733_v46  ;;  %v6740_v46 = vld [vmem:[#allocation36_spill] sm:$0xff] }
  0xf7   : > { %4940 = vmatmul.mubr.msk.f32.gmra.mrb[14].mxu0 %vm169_vm1, %v6047_v34  ;;  %4721 = vmatprep.mubr.msk.f32.mxu1 %vm169_vm1, %v6734_v3  ;;  %v6741_v3 = vld [vmem:[#allocation15_spill] sm:$0xff] }
  0xf8   : > { %4942 = vmatprep.mubr.msk.f32.mxu0 %vm169_vm1, %v6049_v5  ;;  %5017 = vmatpush3.msk.msra.mxu1 %vm419_vm0, %v5532_v2  ;;  %v6738_v2 = vld [vmem:[#allocation35_spill] sm:$0xff] }
  0xfa   : > { %4722 = vmatmul.mubr.msk.f32.gmra.mrb[2].mxu1 %vm169_vm1, %v5677_v37  ;;  %v6739_v37 = vld [vmem:[#allocation13_spill] sm:$0xff] }
  0xfb   : > { %4943 = vmatmul.mubr.msk.f32.gmra.mrb[16].mxu0 %vm169_vm1, %v6064_v32  ;;  %4724 = vmatprep.mubr.msk.f32.mxu1 %vm169_vm1, %v6735_v7  ;;  %v6743_v7 = vld [vmem:[#allocation17_spill] sm:$0xff] }
  0xfc   : > { %4945 = vmatprep.mubr.msk.f32.mxu0 %vm169_vm1, %v6736_v51 }
  0xfe   : > { %4725 = vmatmul.mubr.msk.f32.gmra.mrb[4].mxu1 %vm169_vm1, %v6737_v61  ;;  %v6744_v61 = vld [vmem:[#allocation19_spill] sm:$0xff] }
  0xff   : > { %4946 = vmatmul.mubr.msk.f32.gmra.mrb[18].mxu0 %vm169_vm1, %v6080_v17  ;;  %4727 = vmatprep.mubr.msk.f32.mxu1 %vm169_vm1, %v5701_v43  ;;  %v6742_v43 = vld [vmem:[#allocation37_spill] sm:$0xff] }
 0x100   : > { %4948 = vmatprep.mubr.msk.f32.mxu0 %vm169_vm1, %v6738_v2 }
 0x102   : > { %4728 = vmatmul.mubr.msk.f32.gmra.mrb[6].mxu1 %vm169_vm1, %v6739_v37  ;;  %v3052_v37 = vld [vmem:[#allocation2 + $0x1a1] sm:$0xff] }
 0x103   : > { %4949 = vmatmul.mubr.msk.f32.gmra.mrb[20].mxu0 %vm169_vm1, %v6092_v41  ;;  %4730 = vmatprep.mubr.msk.f32.mxu1 %vm169_vm1, %v5717_v47  ;;  %v6322_v47 = vld [vmem:[#allocation2 + $0x181] sm:$0xff] }
 0x104   : > { %4951 = vmatprep.mubr.msk.f32.mxu0 %vm169_vm1, %v6740_v46 }
 0x106   : > { %4731 = vmatmul.mubr.msk.f32.gmra.mrb[8].mxu1 %vm169_vm1, %v6741_v3 }
 0x107   : > { %4952 = vmatmul.mubr.msk.f32.gmra.mrb[22].mxu0 %vm169_vm1, %v6104_v45  ;;  %4733 = vmatprep.mubr.msk.f32.mxu1 %vm169_vm1, %v5734_v52  ;;  %v6332_v52 = vld [vmem:[#allocation2 + $0x189] sm:$0xff] }
 0x108   : > { %4954 = vmatprep.mubr.msk.f32.mxu0 %vm169_vm1, %v6742_v43 }
 0x10a   : > { %4734 = vmatmul.mubr.msk.f32.gmra.mrb[10].mxu1 %vm169_vm1, %v6743_v7 }
 0x10b   : > { %4955 = vmatmul.mubr.msk.f32.gmra.mrb[24].mxu0 %vm169_vm1, %v6116_v49  ;;  %4736 = vmatprep.mubr.msk.f32.mxu1 %vm169_vm1, %v5764_v63  ;;  %v3051_v63 = vld [vmem:[#allocation2 + $0x199] sm:$0xff] }
 0x10c   : > { %4957 = vmatprep.mubr.msk.f32.mxu0 %vm169_vm1, %v6118_v35 }
 0x10e   : > { %4737 = vmatmul.mubr.msk.f32.gmra.mrb[12].mxu1 %vm169_vm1, %v6744_v61 }
 0x10f   : > { %4958 = vmatmul.mubr.msk.f32.gmra.mrb[26].mxu0 %vm169_vm1, %v6128_v60  ;;  %4739 = vmatprep.mubr.msk.f32.mxu1 %vm169_vm1, %v5781_v4  ;;  %v6745_v4 = vld [vmem:[#allocation21_spill] sm:$0xff] }
 0x110   : > { %4960 = vmatprep.mubr.msk.f32.mxu0 %vm169_vm1, %v6322_v47 }
 0x112   : > { %4740 = vmatmul.mubr.msk.f32.gmra.mrb[14].mxu1 %vm169_vm1, %v5793_v6  ;;  %v6746_v6 = vld [vmem:[#allocation24_spill] sm:$0xff] }
 0x113   : > { %4961 = vmatmul.mubr.msk.f32.gmra.mrb[28].mxu0 %vm169_vm1, %v6332_v52  ;;  %4742 = vmatprep.mubr.msk.f32.mxu1 %vm169_vm1, %v5797_v8  ;;  %v6747_v8 = vld [vmem:[#allocation38_spill] sm:$0xff] }
 0x114   : > { %4963 = vmatprep.mubr.msk.f32.mxu0 %vm169_vm1, %v3051_v63 }
 0x116   : > { %4743 = vmatmul.mubr.msk.f32.gmra.mrb[16].mxu1 %vm169_vm1, %v5813_v13 }
 0x117   : > { %4964 = vmatmul.mubr.msk.f32.gmra.mrb[30].mxu0 %vm169_vm1, %v3052_v37  ;;  %4745 = vmatprep.mubr.msk.f32.mxu1 %vm169_vm1, %v5817_v15 }
 0x118   : > { %4968 = vmatprep.mubr.msk.f32.mxu0 %vm169_vm1, %v5819_v16 }
 0x11a   : > { %4746 = vmatmul.mubr.msk.f32.gmra.mrb[18].mxu1 %vm169_vm1, %v5834_v18 }
 0x11b   : > { %4969 = vmatmul.mubr.msk.f32.vlgmr.msra.gmra.mrb[0].mxu0 %vm169_vm1, %v5836_v19  ;;  %4748 = vmatprep.mubr.msk.f32.mxu1 %vm169_vm1, %v5840_v20 }
 0x11c   : > { %4971 = vmatprep.mubr.msk.f32.mxu0 %vm169_vm1, %v5842_v21 }
 0x11e   : > { %4749 = vmatmul.mubr.msk.f32.gmra.mrb[20].mxu1 %vm169_vm1, %v5854_v22 }
 0x11f   : > { %4972 = vmatmul.mubr.msk.f32.gmra.mrb[2].mxu0 %vm169_vm1, %v5856_v23  ;;  %4751 = vmatprep.mubr.msk.f32.mxu1 %vm169_vm1, %v5858_v24 }
 0x120   : > { %4974 = vmatprep.mubr.msk.f32.mxu0 %vm169_vm1, %v5860_v25  ;;  %v6476_v25 = vld [vmem:[%s6632_s2] ss:$0 sm:$0xff] }
 0x122   : > { %4752 = vmatmul.mubr.msk.f32.gmra.mrb[22].mxu1 %vm169_vm1, %v5870_v26 }
 0x123   : > { %4975 = vmatmul.mubr.msk.f32.gmra.mrb[4].mxu0 %vm169_vm1, %v5872_v27  ;;  %4754 = vmatprep.mubr.msk.f32.mxu1 %vm169_vm1, %v5874_v28 }
 0x124   : > { %4977 = vmatprep.mubr.msk.f32.mxu0 %vm169_vm1, %v5876_v29 }
 0x126   : > { %4755 = vmatmul.mubr.msk.f32.gmra.mrb[24].mxu1 %vm169_vm1, %v5886_v30 }
 0x127   : > { %4978 = vmatmul.mubr.msk.f32.gmra.mrb[6].mxu0 %vm169_vm1, %v5888_v50  ;;  %4757 = vmatprep.mubr.msk.f32.mxu1 %vm169_vm1, %v5890_v53 }
 0x128   : > { %4980 = vmatprep.mubr.msk.f32.mxu0 %vm169_vm1, %v5892_v55 }
 0x12a   : > { %4758 = vmatmul.mubr.msk.f32.gmra.mrb[26].mxu1 %vm169_vm1, %v6745_v4 }
 0x12b   : > { %4981 = vmatmul.mubr.msk.f32.gmra.mrb[8].mxu0 %vm169_vm1, %v6716_v1  ;;  %4760 = vmatprep.mubr.msk.f32.mxu1 %vm169_vm1, %v5906_v58 }
 0x12c   : > { %4983 = vmatprep.mubr.msk.f32.mxu0 %vm169_vm1, %v6718_v14 }
 0x12e   : > { %4761 = vmatmul.mubr.msk.f32.gmra.mrb[28].mxu1 %vm169_vm1, %v6746_v6 }
 0x12f   : > { %4984 = vmatmul.mubr.msk.f32.gmra.mrb[10].mxu0 %vm169_vm1, %v5920_v10  ;;  %4763 = vmatprep.mubr.msk.f32.mxu1 %vm169_vm1, %v6747_v8 }
 0x130   : > { %4986 = vmatprep.mubr.msk.f32.mxu0 %vm169_vm1, %v5922_v33  ;;  %v6748_v33 = vld [vmem:[#allocation32_spill] sm:$0xff] }
 0x132   : > { %4764 = vmatmul.mubr.msk.f32.gmra.mrb[30].mxu1 %vm169_vm1, %v6198_v62 }
 0x133   : > { %4987 = vmatmul.mubr.msk.f32.gmra.mrb[12].mxu0 %vm169_vm1, %v5931_v59  ;;  %4792 = vmatprep.mubr.msk.f32.mxu1 %vm169_vm1, %v6037_v0 }
 0x134   : > { %4989 = vmatprep.mubr.msk.f32.mxu0 %vm169_vm1, %v5933_v57 }
 0x136   : > { %4793 = vmatmul.mubr.msk.f32.vlgmr.msra.gmra.mrb[16].mxu1 %vm169_vm1, %v6047_v34 }
 0x137   : > { %4990 = vmatmul.mubr.msk.f32.gmra.mrb[14].mxu0 %vm169_vm1, %v6719_v39  ;;  %4795 = vmatprep.mubr.msk.f32.mxu1 %vm169_vm1, %v6049_v5 }
 0x138   : > { %4992 = vmatprep.mubr.msk.f32.mxu0 %vm169_vm1, %v5951_v31 }
 0x13a   : > { %4796 = vmatmul.mubr.msk.f32.gmra.mrb[18].mxu1 %vm169_vm1, %v6064_v32 }
 0x13b   : > { %4993 = vmatmul.mubr.msk.f32.gmra.mrb[16].mxu0 %vm169_vm1, %v6721_v9  ;;  %4798 = vmatprep.mubr.msk.f32.mxu1 %vm169_vm1, %v6736_v51 }
 0x13c   : > { %4995 = vmatprep.mubr.msk.f32.mxu0 %vm169_vm1, %v5965_v11 }
 0x13e   : > { %4799 = vmatmul.mubr.msk.f32.gmra.mrb[20].mxu1 %vm169_vm1, %v6080_v17 }
 0x13f   : > { %4996 = vmatmul.mubr.msk.f32.gmra.mrb[18].mxu0 %vm169_vm1, %v6723_v38  ;;  %4801 = vmatprep.mubr.msk.f32.mxu1 %vm169_vm1, %v6738_v2 }
 0x140   : > { %4998 = vmatprep.mubr.msk.f32.mxu0 %vm169_vm1, %v5977_v12 }
 0x142   : > { %4802 = vmatmul.mubr.msk.f32.gmra.mrb[22].mxu1 %vm169_vm1, %v6092_v41  ;;  %v3442_v41 = vld [vmem:[#allocation2 + $0x1a2] sm:$0xff] }
 0x143   : > { %4999 = vmatmul.mubr.msk.f32.gmra.mrb[20].mxu0 %vm169_vm1, %v6725_v56  ;;  %4804 = vmatprep.mubr.msk.f32.mxu1 %vm169_vm1, %v6740_v46 }
 0x144   : > { %5001 = vmatprep.mubr.msk.f32.mxu0 %vm169_vm1, %v5989_v40  ;;  %v3441_v40 = vld [vmem:[#allocation2 + $0x19a] sm:$0xff] }
 0x146   : > { %4805 = vmatmul.mubr.msk.f32.gmra.mrb[24].mxu1 %vm169_vm1, %v6104_v45 }
 0x147   : > { %5002 = vmatmul.mubr.msk.f32.gmra.mrb[22].mxu0 %vm169_vm1, %v6727_v36  ;;  %4807 = vmatprep.mubr.msk.f32.mxu1 %vm169_vm1, %v6742_v43 }
 0x148   : > { %5004 = vmatprep.mubr.msk.f32.mxu0 %vm169_vm1, %v6001_v44 }
 0x14a   : > { %4808 = vmatmul.mubr.msk.f32.gmra.mrb[26].mxu1 %vm169_vm1, %v6116_v49 }
 0x14b   : > { %5005 = vmatmul.mubr.msk.f32.gmra.mrb[24].mxu0 %vm169_vm1, %v6729_v54  ;;  %4810 = vmatprep.mubr.msk.f32.mxu1 %vm169_vm1, %v6118_v35  ;;  %v6749_v35 = vld [vmem:[#allocation33_spill] sm:$0xff] }
 0x14c   : > { %5007 = vmatprep.mubr.msk.f32.mxu0 %vm169_vm1, %v6013_v48 }
 0x14e   : > { %4811 = vmatmul.mubr.msk.f32.gmra.mrb[28].mxu1 %vm169_vm1, %v6128_v60 }
 0x14f   : > { %5008 = vmatmul.mubr.msk.f32.gmra.mrb[26].mxu0 %vm169_vm1, %v6731_v42  ;;  %4813 = vmatprep.mubr.msk.f32.mxu1 %vm169_vm1, %v6322_v47 }
 0x150   : > { %5010 = vmatprep.mubr.msk.f32.mxu0 %vm169_vm1, %v6748_v33 }
 0x152   : > { %4814 = vmatmul.mubr.msk.f32.gmra.mrb[30].mxu1 %vm169_vm1, %v6332_v52 }
 0x153   : > { %5011 = vmatmul.mubr.msk.f32.gmra.mrb[28].mxu0 %vm169_vm1, %v6749_v35 }
 0x154   : > { %5013 = vmatprep.mubr.msk.f32.mxu0 %vm169_vm1, %v3441_v40 }
 0x157   : > { %5014 = vmatmul.mubr.msk.f32.gmra.mrb[30].mxu0 %vm169_vm1, %v3442_v41 }
 0x1c9   : > { %v4720_v44 = vpop.f32.mrb[0].mxu1 }
 0x1ca   : > { %v1659_v45 = vpop.f32.mrb[1].mxu1 }
 0x1cd   : > { %v4723_v48 = vpop.f32.mrb[2].mxu1 }
 0x1ce   : > { %v1669_v49 = vpop.f32.mrb[3].mxu1 }
 0x1d1   : > { %v4726_v60 = vpop.f32.mrb[4].mxu1 }
 0x1d2   : > { %v1679_v0 = vpop.f32.mrb[5].mxu1 }
 0x1d5   : > { %v4729_v5 = vpop.f32.mrb[6].mxu1 }
 0x1d6   : > { %v1689_v13 = vpop.f32.mrb[7].mxu1 }
 0x1d9   : > { %v4732_v15 = vpop.f32.mrb[8].mxu1 }
 0x1da   : > { %v1699_v16 = vpop.f32.mrb[9].mxu1 }
 0x1dd   : > { %v4735_v18 = vpop.f32.mrb[10].mxu1 }
 0x1de   : > { %v1709_v19 = vpop.f32.mrb[11].mxu1 }
 0x1e1   : > { %v4738_v20 = vpop.f32.mrb[12].mxu1 }
 0x1e2   : > { %v1719_v21 = vpop.f32.mrb[13].mxu1 }
 0x1e5   : > { %v6466_v22 = vpop.f32.mrb[14].mxu1 }
 0x1e6   : > { %v6468_v23 = vpop.f32.mrb[15].mxu1 }
 0x1ee   : > { %v4970_v24 = vpop.f32.mrb[0].mxu0 }
 0x1ef   : > { %v5018_v26 = vadd.f32 %v4970_v24, %v4720_v44  ;;  %v3610_v27 = vpop.f32.mrb[1].mxu0 }
 0x1f0   : > { %v5019_v28 = vadd.f32 %v3610_v27, %v1659_v45 }
 0x1f1   : > { %v3809_v29 = vadd.f32 %v5018_v26, %v6476_v25 }
 0x1f2   : > { %v3808_v30 = vadd.f32 %v5019_v28, %v6476_v25  ;;  %v4973_v50 = vpop.f32.mrb[2].mxu0 }
 0x1f3   : > { %3842 = vst.msk [vmem:[%s6480_s6 + $0x8] sm:$0xff] %vm3840_vm3, %v3809_v29  ;;  %v5020_v53 = vadd.f32 %v4973_v50, %v4723_v48  ;;  %v3620_v55 = vpop.f32.mrb[3].mxu0 }
 0x1f4   : > { %3841 = vst.msk [vmem:[%s6480_s6] sm:$0xff] %vm3840_vm3, %v3808_v30  ;;  %v5021_v57 = vadd.f32 %v3620_v55, %v1669_v49 }
 0x1f5   : > { %v3811_v58 = vadd.f32 %v5020_v53, %v6476_v25 }
 0x1f6   : > { %v3810_v59 = vadd.f32 %v5021_v57, %v6476_v25  ;;  %v4976_v10 = vpop.f32.mrb[4].mxu0 }
 0x1f7   : > { %3844 = vst.msk [vmem:[%s6480_s6 + $0x18] sm:$0xff] %vm3840_vm3, %v3811_v58  ;;  %v5022_v12 = vadd.f32 %v4976_v10, %v4726_v60  ;;  %v3630_v31 = vpop.f32.mrb[5].mxu0 }
 0x1f8   : > { %3843 = vst.msk [vmem:[%s6480_s6 + $0x10] sm:$0xff] %vm3840_vm3, %v3810_v59  ;;  %v5023_v32 = vadd.f32 %v3630_v31, %v1679_v0 }
 0x1f9   : > { %v3813_v11 = vadd.f32 %v5022_v12, %v6476_v25 }
 0x1fa   : > { %v3812_v34 = vadd.f32 %v5023_v32, %v6476_v25  ;;  %v4979_v17 = vpop.f32.mrb[6].mxu0 }
 0x1fb   : > { %3846 = vst.msk [vmem:[%s6480_s6 + $0x28] sm:$0xff] %vm3840_vm3, %v3813_v11  ;;  %v5024_v39 = vadd.f32 %v4979_v17, %v4729_v5  ;;  %v3640_v1 = vpop.f32.mrb[7].mxu0 }
 0x1fc   : > { %3845 = vst.msk [vmem:[%s6480_s6 + $0x20] sm:$0xff] %vm3840_vm3, %v3812_v34  ;;  %v5025_v14 = vadd.f32 %v3640_v1, %v1689_v13 }
 0x1fd   : > { %v3815_v62 = vadd.f32 %v5024_v39, %v6476_v25 }
 0x1fe   : > { %v3814_v9 = vadd.f32 %v5025_v14, %v6476_v25  ;;  %v4982_v38 = vpop.f32.mrb[8].mxu0 }
 0x1ff   : > { %3848 = vst.msk [vmem:[%s6480_s6 + $0x38] sm:$0xff] %vm3840_vm3, %v3815_v62  ;;  %v5026_v56 = vadd.f32 %v4982_v38, %v4732_v15  ;;  %v3650_v36 = vpop.f32.mrb[9].mxu0 }
 0x200   : > { %3847 = vst.msk [vmem:[%s6480_s6 + $0x30] sm:$0xff] %vm3840_vm3, %v3814_v9  ;;  %v5027_v54 = vadd.f32 %v3650_v36, %v1699_v16 }
 0x201   : > { %v3817_v42 = vadd.f32 %v5026_v56, %v6476_v25 }
 0x202   : > { %v3816_v51 = vadd.f32 %v5027_v54, %v6476_v25  ;;  %v4985_v2 = vpop.f32.mrb[10].mxu0 }
 0x203   : > { %3850 = vst.msk [vmem:[%s6480_s6 + $0x48] sm:$0xff] %vm3840_vm3, %v3817_v42  ;;  %v5028_v46 = vadd.f32 %v4985_v2, %v4735_v18  ;;  %v3660_v3 = vpop.f32.mrb[11].mxu0 }
 0x204   : > { %3849 = vst.msk [vmem:[%s6480_s6 + $0x40] sm:$0xff] %vm3840_vm3, %v3816_v51  ;;  %v5029_v43 = vadd.f32 %v3660_v3, %v1709_v19 }
 0x205   : > { %v3819_v7 = vadd.f32 %v5028_v46, %v6476_v25 }
 0x206   : > { %v3818_v47 = vadd.f32 %v5029_v43, %v6476_v25  ;;  %v4988_v61 = vpop.f32.mrb[12].mxu0 }
 0x207   : > { %3852 = vst.msk [vmem:[%s6480_s6 + $0x58] sm:$0xff] %vm3840_vm3, %v3819_v7  ;;  %v5030_v52 = vadd.f32 %v4988_v61, %v4738_v20  ;;  %v3670_v63 = vpop.f32.mrb[13].mxu0 }
 0x208   : > { %3851 = vst.msk [vmem:[%s6480_s6 + $0x50] sm:$0xff] %vm3840_vm3, %v3818_v47  ;;  %v5031_v37 = vadd.f32 %v3670_v63, %v1719_v21 }
 0x209   : > { %v3821_v4 = vadd.f32 %v5030_v52, %v6476_v25  ;;  %v4794_v8 = vpop.f32.mrb[16].mxu1 }
 0x20a   : > { %v3820_v6 = vadd.f32 %v5031_v37, %v6476_v25  ;;  %v4991_v33 = vpop.f32.mrb[14].mxu0  ;;  %v2129_v35 = vpop.f32.mrb[17].mxu1 }
 0x20b   : > { %3854 = vst.msk [vmem:[%s6480_s6 + $0x68] sm:$0xff] %vm3840_vm3, %v3821_v4  ;;  %v5032_v40 = vadd.f32 %v4991_v33, %v6466_v22  ;;  %v3680_v41 = vpop.f32.mrb[15].mxu0 }
 0x20c   : > { %3853 = vst.msk [vmem:[%s6480_s6 + $0x60] sm:$0xff] %vm3840_vm3, %v3820_v6  ;;  %v5033_v44 = vadd.f32 %v3680_v41, %v6468_v23 }
 0x20d   : > { %v3823_v45 = vadd.f32 %v5032_v40, %v6476_v25  ;;  %v4797_v49 = vpop.f32.mrb[18].mxu1 }
 0x20e   : > { %v3822_v48 = vadd.f32 %v5033_v44, %v6476_v25  ;;  %v4994_v60 = vpop.f32.mrb[16].mxu0  ;;  %v2139_v5 = vpop.f32.mrb[19].mxu1 }
 0x20f   : > { %3856 = vst.msk [vmem:[%s6480_s6 + $0x78] sm:$0xff] %vm3840_vm3, %v3823_v45  ;;  %v5034_v0 = vadd.f32 %v4994_v60, %v4794_v8  ;;  %v3690_v13 = vpop.f32.mrb[17].mxu0 }
 0x210   : > { %3855 = vst.msk [vmem:[%s6480_s6 + $0x70] sm:$0xff] %vm3840_vm3, %v3822_v48  ;;  %v5035_v15 = vadd.f32 %v3690_v13, %v2129_v35 }
 0x211   : > { %v3825_v16 = vadd.f32 %v5034_v0, %v6476_v25  ;;  %v4800_v19 = vpop.f32.mrb[20].mxu1 }
 0x212   : > { %v3824_v18 = vadd.f32 %v5035_v15, %v6476_v25  ;;  %v4997_v20 = vpop.f32.mrb[18].mxu0  ;;  %v2149_v22 = vpop.f32.mrb[21].mxu1 }
 0x213   : > { %3858 = vst.msk [vmem:[%s6480_s6 + $0x88] sm:$0xff] %vm3840_vm3, %v3825_v16  ;;  %v5036_v21 = vadd.f32 %v4997_v20, %v4797_v49  ;;  %v3700_v23 = vpop.f32.mrb[19].mxu0 }
 0x214   : > { %3857 = vst.msk [vmem:[%s6480_s6 + $0x80] sm:$0xff] %vm3840_vm3, %v3824_v18  ;;  %v5037_v24 = vadd.f32 %v3700_v23, %v2139_v5 }
 0x215   : > { %v3827_v26 = vadd.f32 %v5036_v21, %v6476_v25  ;;  %v4803_v28 = vpop.f32.mrb[22].mxu1 }
 0x216   : > { %v3826_v27 = vadd.f32 %v5037_v24, %v6476_v25  ;;  %v5000_v29 = vpop.f32.mrb[20].mxu0  ;;  %v2159_v50 = vpop.f32.mrb[23].mxu1 }
 0x217   : > { %3860 = vst.msk [vmem:[%s6480_s6 + $0x98] sm:$0xff] %vm3840_vm3, %v3827_v26  ;;  %v5038_v30 = vadd.f32 %v5000_v29, %v4800_v19  ;;  %v3710_v53 = vpop.f32.mrb[21].mxu0 }
 0x218   : > { %3859 = vst.msk [vmem:[%s6480_s6 + $0x90] sm:$0xff] %vm3840_vm3, %v3826_v27  ;;  %v5039_v55 = vadd.f32 %v3710_v53, %v2149_v22 }
 0x219   : > { %v3829_v57 = vadd.f32 %v5038_v30, %v6476_v25  ;;  %v4806_v59 = vpop.f32.mrb[24].mxu1 }
 0x21a   : > { %v3828_v58 = vadd.f32 %v5039_v55, %v6476_v25  ;;  %v5003_v10 = vpop.f32.mrb[22].mxu0  ;;  %v2169_v31 = vpop.f32.mrb[25].mxu1 }
 0x21b   : > { %3862 = vst.msk [vmem:[%s6480_s6 + $0xa8] sm:$0xff] %vm3840_vm3, %v3829_v57  ;;  %v5040_v12 = vadd.f32 %v5003_v10, %v4803_v28  ;;  %v3720_v32 = vpop.f32.mrb[23].mxu0 }
 0x21c   : > { %3861 = vst.msk [vmem:[%s6480_s6 + $0xa0] sm:$0xff] %vm3840_vm3, %v3828_v58  ;;  %v5041_v11 = vadd.f32 %v3720_v32, %v2159_v50 }
 0x21d   : > { %v3831_v34 = vadd.f32 %v5040_v12, %v6476_v25  ;;  %v4809_v39 = vpop.f32.mrb[26].mxu1 }
 0x21e   : > { %v3830_v17 = vadd.f32 %v5041_v11, %v6476_v25  ;;  %v5006_v1 = vpop.f32.mrb[24].mxu0  ;;  %v2179_v62 = vpop.f32.mrb[27].mxu1 }
 0x21f   : > { %3864 = vst.msk [vmem:[%s6480_s6 + $0xb8] sm:$0xff] %vm3840_vm3, %v3831_v34  ;;  %v5042_v14 = vadd.f32 %v5006_v1, %v4806_v59  ;;  %v3730_v9 = vpop.f32.mrb[25].mxu0 }
 0x220   : > { %3863 = vst.msk [vmem:[%s6480_s6 + $0xb0] sm:$0xff] %vm3840_vm3, %v3830_v17  ;;  %v5043_v38 = vadd.f32 %v3730_v9, %v2169_v31 }
 0x221   : > { %v3833_v56 = vadd.f32 %v5042_v14, %v6476_v25  ;;  %v4812_v54 = vpop.f32.mrb[28].mxu1 }
 0x222   : > { %v3832_v36 = vadd.f32 %v5043_v38, %v6476_v25  ;;  %v5009_v42 = vpop.f32.mrb[26].mxu0  ;;  %v2189_v2 = vpop.f32.mrb[29].mxu1 }
 0x223   : > { %3866 = vst.msk [vmem:[%s6480_s6 + $0xc8] sm:$0xff] %vm3840_vm3, %v3833_v56  ;;  %v5044_v51 = vadd.f32 %v5009_v42, %v4809_v39  ;;  %v3740_v46 = vpop.f32.mrb[27].mxu0 }
 0x224   : > { %3865 = vst.msk [vmem:[%s6480_s6 + $0xc0] sm:$0xff] %vm3840_vm3, %v3832_v36  ;;  %v5045_v3 = vadd.f32 %v3740_v46, %v2179_v62 }
 0x225   : > { %v3835_v43 = vadd.f32 %v5044_v51, %v6476_v25  ;;  %v4815_v47 = vpop.f32.mrb[30].mxu1 }
 0x226   : > { %v3834_v7 = vadd.f32 %v5045_v3, %v6476_v25  ;;  %v5012_v61 = vpop.f32.mrb[28].mxu0  ;;  %v2199_v63 = vpop.f32.mrb[31].mxu1 }
 0x227   : > { %3868 = vst.msk [vmem:[%s6480_s6 + $0xd8] sm:$0xff] %vm3840_vm3, %v3835_v43  ;;  %v5046_v52 = vadd.f32 %v5012_v61, %v4812_v54  ;;  %v3750_v37 = vpop.f32.mrb[29].mxu0 }
 0x228   : > { %3867 = vst.msk [vmem:[%s6480_s6 + $0xd0] sm:$0xff] %vm3840_vm3, %v3834_v7  ;;  %v5047_v4 = vadd.f32 %v3750_v37, %v2189_v2 }
 0x229   : > { %v3837_v6 = vadd.f32 %v5046_v52, %v6476_v25 }
 0x22a   : > { %v3836_v8 = vadd.f32 %v5047_v4, %v6476_v25  ;;  %v5015_v33 = vpop.f32.mrb[30].mxu0 }
 0x22b   : > { %3870 = vst.msk [vmem:[%s6480_s6 + $0xe8] sm:$0xff] %vm3840_vm3, %v3837_v6  ;;  %v5048_v40 = vadd.f32 %v5015_v33, %v4815_v47  ;;  %v3760_v35 = vpop.f32.mrb[31].mxu0 }
 0x22c   : > { %3869 = vst.msk [vmem:[%s6480_s6 + $0xe0] sm:$0xff] %vm3840_vm3, %v3836_v8  ;;  %v5049_v41 = vadd.f32 %v3760_v35, %v2199_v63 }
 0x22d   : > { %v3839_v44 = vadd.f32 %v5048_v40, %v6476_v25 }
 0x22e   : > { %v3838_v45 = vadd.f32 %v5049_v41, %v6476_v25 }
 0x22f   : > { %3872 = vst.msk [vmem:[%s6480_s6 + $0xf8] sm:$0xff] %vm3840_vm3, %v3839_v44 }
 0x230   : > { %3871 = vst.msk [vmem:[%s6480_s6 + $0xf0] sm:$0xff] %vm3840_vm3, %v3838_v45 }
 0x231   : > { %5329 = shalt.err (!%p5326_p3)
}
 0x232   : > { %s5330_s25 = scalar_lea.hbm %s6578_s11, 4096  ;;  %s5334_s28 = scalar_lea.hbm %s6633_s3, 8192 }
 0x233   : > { %p5331_p4 = scmp.ne.s32.totalorder %s6578_s11, %s5330_s25  ;;  %p5335_p9 = scmp.lt.u32.totalorder %s6578_s11, %s6633_s3 }
 0x234   : > { %p5336_p10 = scmp.lt.u32.totalorder %s5334_s28, %s5330_s25  ;;  %p5338_p12 = scmp.lt.u32.totalorder %s5330_s25, %s6578_s11 }
 0x235   : > { %p5332_p7 = pnand %p5331_p4, %p5442_p5 }
 0x236   : > { %p5337_p11 = por %p5336_p10, %p5335_p9 }
 0x237   : > { %p5333_p8 = pneg %p5332_p7 }
 0x238   : > { %p5339_p13 = por %p5338_p12, %p5337_p11 }
 0x23a   : > { %p5340_p0 = pnand %p5339_p13, %p5333_p8 }
 0x23c   : > { %5343 = shalt.err (!%p5340_p0)
}
 0x23d   : > { %s5382_s4 = smov 128   ;;  %s5383_s5 = smov 8  }
 0x23e   : > { %5274 = dma.vmem_to_hbm [thread:$0]  (%p5442_p5), %s6580_s8, 4096, %s6578_s11, %s6589_s16, %s5382_s4, %s5382_s4, %s5383_s5  }
 0x23f PF: > { %p5280_p1 = scmp.ge.s32.totalorder %s5378_s15, 2  ;;  %s3902_s6 = sand.u32 1, %s5366_s12  }
 0x240   : > { %s3903_s7 = scalar_lea.sflag [#allocation4], %s3902_s6 }
 0x241   : > { %p5277_p2 = pnand %p5280_p1, %p5446_p6 }
 0x243   : > { %5361 = dma.done.wait (!%p5277_p2), %s3903_s7, 4096  }
 0x244   : > { %5363 = vsyncadd (!%p5277_p2), %s3903_s7, 4294963200  ;;  %p13_p3 = scmp.ge.s32.totalorder %s5429_s18, 4   ;;  %s6750_s12 = smov %s5370_s13 }
 0x245   : > { %s6751_s13 = smov %s5374_s14  ;;  %s6752_s14 = smov %s5440_s21 }
 0x246   : > { %s6753_s15 = smov %s5429_s18  ;;  %15 = sbr.rel (!%p13_p3) target bundleno = 3 (0x3), region = 77 }
 0x24d   :  { %3908 = vsyncpa [#allocation4], 1 }
 0x24e   :  { %3910 = vsyncpa [#allocation4 + $0x1], 1 }

</bundles_post_ra>
